<compile_context>
chip_gen: v7x
topology: tpu7x:2x2x1
jax: 0.10.0
libtpu: 0.0.40
codegen_flags: <defaults>
</compile_context>

<pallas_src>
import functools

import jax
import jax.numpy as jnp
from jax import lax
from jax.experimental import pallas as pl
from jax.experimental.pallas import tpu as pltpu


# ----------------------------------------------------------------------------
# Fused flash-style kernel. Grid = (batch, q_tile, kv_tile), kv innermost.
# ----------------------------------------------------------------------------
def _flash_attention_kernel(
    xq_ref, xkv_ref, w_qkv_ref, w_proj_ref, b_proj_ref,   # inputs
    o_ref,                                                # output
    q_scr, m_scr, l_scr, acc_scr,                         # VMEM scratch
    *, num_heads, head_dim, scale, compute_dtype):
    H, D = num_heads, head_dim
    C = H * D
    f32 = jnp.float32
    cdt = compute_dtype

    ki = pl.program_id(2)
    n_kv = pl.num_programs(2)

    # x (n, C_in) . W (C_out, C_in) contracted on the last dims -> (n, C_out)
    # (keeps the PyTorch nn.Linear (out, in) layout — no transposes).
    def proj(x, w):
        return lax.dot_general(x, w, (((1,), (1,)), ((), ())),
                               preferred_element_type=f32)

    # ---- per (batch, q-tile) init: q projection (cached) + softmax state ----
    @pl.when(ki == 0)
    def _init():
        xq = xq_ref[0].astype(cdt)                                   # (tq, C)
        q = proj(xq, w_qkv_ref[0:C, :].astype(cdt)) * scale          # (tq, C) f32
        q_scr[...] = q.astype(q_scr.dtype)
        m_scr[...] = jnp.full_like(m_scr, -jnp.inf)
        l_scr[...] = jnp.zeros_like(l_scr)
        acc_scr[...] = jnp.zeros_like(acc_scr)

    # ---- per kv tile: k/v projection (one matmul) + online softmax ----------
    xkv = xkv_ref[0].astype(cdt)                                     # (tkv, C)
    kv = proj(xkv, w_qkv_ref[C:3 * C, :].astype(cdt))                # (tkv, 2C) f32
    k = kv[:, :C].astype(cdt)
    v = kv[:, C:].astype(cdt)
    q_all = q_scr[...]                                               # (tq, C)

    for h in range(H):           # static unroll; live range bounded by slab store
        q_h = q_all[:, h * D:(h + 1) * D]                            # (tq, D)
        k_h = k[:, h * D:(h + 1) * D]                                # (tkv, D)
        v_h = v[:, h * D:(h + 1) * D]                                # (tkv, D)

        # q_h @ k_h^T without materializing a transpose.
        s = lax.dot_general(q_h, k_h, (((1,), (1,)), ((), ())),
                            preferred_element_type=f32)              # (tq, tkv)

        m_prev = m_scr[h]                                            # (tq, 1)
        l_prev = l_scr[h]
        m_new = jnp.maximum(m_prev, jnp.max(s, axis=-1, keepdims=True))
        alpha = jnp.exp(m_prev - m_new)
        p = jnp.exp(s - m_new)                                       # (tq, tkv) f32
        l_scr[h] = alpha * l_prev + jnp.sum(p, axis=-1, keepdims=True)
        m_scr[h] = m_new

        pv = jnp.dot(p.astype(cdt), v_h, preferred_element_type=f32)  # (tq, D)
        acc_scr[:, h * D:(h + 1) * D] = (
            alpha * acc_scr[:, h * D:(h + 1) * D] + pv)

    # ---- finalize: post-PV normalization + fused output projection ----------
    @pl.when(ki == n_kv - 1)
    def _finalize():
        for h in range(H):
            inv_l = pl.reciprocal(l_scr[h], approx=False)            # (tq, 1)
            acc_scr[:, h * D:(h + 1) * D] = (
                acc_scr[:, h * D:(h + 1) * D] * inv_l)
        merged = acc_scr[...].astype(cdt)                            # (tq, C)
        y = proj(merged, w_proj_ref[...].astype(cdt))                # (tq, C) f32
        y = y + b_proj_ref[...].astype(f32)
        o_ref[0] = y.astype(o_ref.dtype)


# ----------------------------------------------------------------------------
# Wrapper: one pallas_call for the whole Attention.forward.
# ----------------------------------------------------------------------------
def attention_forward(x, params, num_heads, *, q_tile=128, kv_tile=128,
                      compute_dtype=None, interpret=False):
    B, N, C = x.shape
    H = num_heads
    assert C % H == 0, "dim must be divisible by num_heads"
    D = C // H
    scale = D ** (-0.5)
    cdt = jnp.dtype(compute_dtype) if compute_dtype is not None else x.dtype

    tq = min(q_tile, N)
    tkv = min(kv_tile, N)
    assert N % tq == 0 and N % tkv == 0, "N must be divisible by the tile sizes"
    n_q, n_kv = N // tq, N // tkv

    # Weights keep the PyTorch (out_features, in_features) layout (no .T copies).
    # For the bf16 MXU path the cast should ideally be hoisted out of the
    # jitted forward; here it is a one-shot host-side cast.
    w_qkv = params["w_qkv"].astype(cdt)                  # (3C, C)
    w_proj = params["w_proj"].astype(cdt)                # (C, C)
    b_proj = params["b_proj"].reshape(1, C)              # (1, C), kept f32

    kernel = functools.partial(
        _flash_attention_kernel, num_heads=H, head_dim=D, scale=scale,
        compute_dtype=cdt)

    # Explicit VMEM budget: 2x-buffered x tiles + single-buffered weights +
    # output tile + scratch, with headroom, capped below v7x's 64 MiB physical.
    x_item = x.dtype.itemsize
    c_item = jnp.dtype(cdt).itemsize
    est = (2 * (tq * C + tkv * C) * x_item                 # pipelined x tiles
           + (3 * C * C + C * C + C) * c_item              # resident weights
           + 2 * tq * C * x_item                           # output tile
           + tq * C * c_item                               # q scratch
           + 2 * H * tq * 128 * 4                          # m / l scratch (lane-padded)
           + tq * C * 4)                                   # PV accumulator slab
    vmem_limit = int(min(max(4 * est, 16 * 2 ** 20), 48 * 2 ** 20))

    return pl.pallas_call(
        kernel,
        out_shape=jax.ShapeDtypeStruct((B, N, C), x.dtype),
        grid=(B, n_q, n_kv),
        in_specs=[
            pl.BlockSpec((1, tq, C), lambda b, qi, ki: (b, qi, 0)),    # x -> q rows
            pl.BlockSpec((1, tkv, C), lambda b, qi, ki: (b, ki, 0)),   # x -> kv rows
            pl.BlockSpec(memory_space=pltpu.MemorySpace.VMEM),         # W_qkv (resident, 1-buffer)
            pl.BlockSpec(memory_space=pltpu.MemorySpace.VMEM),         # W_proj (resident, 1-buffer)
            pl.BlockSpec(memory_space=pltpu.MemorySpace.VMEM),         # b_proj (resident, 1-buffer)
        ],
        out_specs=pl.BlockSpec((1, tq, C), lambda b, qi, ki: (b, qi, 0)),
        scratch_shapes=[
            pltpu.VMEM((tq, C), cdt),            # pre-scaled q tile, cached over kv steps
            pltpu.VMEM((H, tq, 1), jnp.float32),  # online-softmax running max
            pltpu.VMEM((H, tq, 1), jnp.float32),  # online-softmax running sum
            pltpu.VMEM((tq, C), jnp.float32),     # un-normalized PV slab (heads at lane offsets)
        ],
        compiler_params=pltpu.CompilerParams(
            dimension_semantics=("parallel", "parallel", "arbitrary"),
            vmem_limit_bytes=vmem_limit),
        interpret=interpret,
    )(x, x, w_qkv, w_proj, b_proj)


# ----------------------------------------------------------------------------
# pure-JAX reference for correctness checking
# ----------------------------------------------------------------------------
def attention_reference(x, params, num_heads):
    B, N, C = x.shape
    H = num_heads
    D = C // H
    scale = D ** (-0.5)
    qkv = x @ params["w_qkv"].T
    qkv = qkv.reshape(B, N, 3, H, D).transpose(2, 0, 3, 1, 4)
    q, k, v = qkv[0], qkv[1], qkv[2]
    attn = jnp.einsum("bhnd,bhmd->bhnm", q, k) * scale
    attn = jax.nn.softmax(attn, axis=-1)
    o = jnp.einsum("bhnm,bhmd->bhnd", attn, v)
    o = o.transpose(0, 2, 1, 3).reshape(B, N, C)
    return o @ params["w_proj"].T + params["b_proj"]


if __name__ == "__main__":
    # Small shapes consistent with the module: dim=C=32, num_heads=8 -> head_dim=4
    B, N, C = 2, 8, 32
    num_heads = 8

    key = jax.random.PRNGKey(0)
    kx, kqkv, kproj, kb = jax.random.split(key, 4)

    x = jax.random.normal(kx, (B, N, C), dtype=jnp.float32)
    params = {
        # PyTorch nn.Linear weight layout: (out_features, in_features)
        "w_qkv": jax.random.normal(kqkv, (3 * C, C), dtype=jnp.float32) * 0.05,
        "w_proj": jax.random.normal(kproj, (C, C), dtype=jnp.float32) * 0.05,
        "b_proj": jax.random.normal(kb, (C,), dtype=jnp.float32) * 0.05,
    }

    ref = attention_reference(x, params, num_heads)

    # f32 MXU-operand path: must track the reference tightly.
    out = jax.block_until_ready(attention_forward(x, params, num_heads))
    assert out.shape == (B, N, C)
    assert jnp.allclose(out, ref, atol=1e-4, rtol=1e-4), "f32 mismatch vs reference"

    # bf16 MXU-operand path (review item for v6e/v7x): bf16 matmul inputs,
    # f32 softmax statistics / f32 accumulation -> looser tolerance.
    out_bf16 = jax.block_until_ready(
        attention_forward(x, params, num_heads, compute_dtype=jnp.bfloat16))
    assert jnp.allclose(out_bf16, ref, atol=3e-2, rtol=3e-2), "bf16 mismatch vs reference"

    print("KERNEL_OK")
</pallas_src>

<mosaic_0001>
module attributes {stable_mosaic.version = 11 : i64} {
  func.func @_flash_attention_kernel(%arg0: i32, %arg1: i32, %arg2: i32, %arg3: memref<1x8x32xf32, #tpu.memory_space<vmem>>, %arg4: memref<1x8x32xf32, #tpu.memory_space<vmem>>, %arg5: memref<96x32xf32, #tpu.memory_space<vmem>>, %arg6: memref<32x32xf32, #tpu.memory_space<vmem>>, %arg7: memref<1x32xf32, #tpu.memory_space<vmem>>, %arg8: memref<1x8x32xf32, #tpu.memory_space<vmem>>, %arg9: memref<8x32xf32, #tpu.memory_space<vmem>>, %arg10: memref<8x8x1xf32, #tpu.memory_space<vmem>>, %arg11: memref<8x8x1xf32, #tpu.memory_space<vmem>>, %arg12: memref<8x32xf32, #tpu.memory_space<vmem>>) attributes {dimension_semantics = [#tpu.dimension_semantics<parallel>, #tpu.dimension_semantics<parallel>, #tpu.dimension_semantics<arbitrary>], iteration_bounds = array<i64: 2, 1, 1>, scalar_prefetch = 0 : i64, scratch_operands = 4 : i64, tpu.core_type = #tpu.core_type<tc>, window_params = [{transform_indices = @transform_0, window_bounds = array<i64: 1, 8, 32>}, {transform_indices = @transform_1, window_bounds = array<i64: 1, 8, 32>}, {pipeline_mode = #tpu.pipeline_mode<synchronous>, transform_indices = @transform_2, window_bounds = array<i64: 96, 32>}, {pipeline_mode = #tpu.pipeline_mode<synchronous>, transform_indices = @transform_3, window_bounds = array<i64: 32, 32>}, {pipeline_mode = #tpu.pipeline_mode<synchronous>, transform_indices = @transform_4, window_bounds = array<i64: 1, 32>}, {transform_indices = @transform_5, window_bounds = array<i64: 1, 8, 32>}]} {
    %c0_i32 = arith.constant 0 : i32
    %0 = arith.cmpi eq, %arg2, %c0_i32 : i32
    %1 = arith.extui %0 : i1 to i32
    %c0_i32_0 = arith.constant 0 : i32
    %2 = arith.cmpi ne, %1, %c0_i32_0 : i32
    scf.if %2 {
      %c0_155 = arith.constant 0 : index
      %c0_156 = arith.constant 0 : index
      %c0_157 = arith.constant 0 : index
      %269 = vector.load %arg3[%c0_155, %c0_156, %c0_157] : memref<1x8x32xf32, #tpu.memory_space<vmem>>, vector<1x8x32xf32>
      %270 = vector.shape_cast %269 : vector<1x8x32xf32> to vector<8x32xf32>
      %c0_158 = arith.constant 0 : index
      %c0_159 = arith.constant 0 : index
      %271 = vector.load %arg5[%c0_158, %c0_159] : memref<96x32xf32, #tpu.memory_space<vmem>>, vector<32x32xf32>
      %cst_160 = arith.constant dense<0.000000e+00> : vector<8x32xf32>
      %272 = tpu.matmul %270, %271, %cst_160 {dimension_numbers = #tpu.dot_dimension_numbers<[1], [1], [0], [0], [0, 0, 1, 0], [], []>} : vector<8x32xf32>, vector<32x32xf32>, vector<8x32xf32> -> vector<8x32xf32>
      %cst_161 = arith.constant 5.000000e-01 : f32
      %273 = vector.broadcast %cst_161 : f32 to vector<8x32xf32>
      %274 = arith.mulf %272, %273 : vector<8x32xf32>
      %c0_162 = arith.constant 0 : index
      %c0_163 = arith.constant 0 : index
      %275 = vector.load %arg9[%c0_162, %c0_163] : memref<8x32xf32, #tpu.memory_space<vmem>>, vector<8x32xf32>
      tpu.vector_store %arg9[%c0_162, %c0_163], %274 {strides = array<i32>} : memref<8x32xf32, #tpu.memory_space<vmem>>, vector<8x32xf32>,
      %cst_164 = arith.constant 0xFF800000 : f32
      %276 = vector.broadcast %cst_164 : f32 to vector<8x8x1xf32>
      %c0_165 = arith.constant 0 : index
      %c0_166 = arith.constant 0 : index
      %c0_167 = arith.constant 0 : index
      %277 = vector.load %arg10[%c0_165, %c0_166, %c0_167] : memref<8x8x1xf32, #tpu.memory_space<vmem>>, vector<8x8x1xf32>
      tpu.vector_store %arg10[%c0_165, %c0_166, %c0_167], %276 {strides = array<i32>} : memref<8x8x1xf32, #tpu.memory_space<vmem>>, vector<8x8x1xf32>,
      %cst_168 = arith.constant 0.000000e+00 : f32
      %278 = vector.broadcast %cst_168 : f32 to vector<8x8x1xf32>
      %c0_169 = arith.constant 0 : index
      %c0_170 = arith.constant 0 : index
      %c0_171 = arith.constant 0 : index
      %279 = vector.load %arg11[%c0_169, %c0_170, %c0_171] : memref<8x8x1xf32, #tpu.memory_space<vmem>>, vector<8x8x1xf32>
      tpu.vector_store %arg11[%c0_169, %c0_170, %c0_171], %278 {strides = array<i32>} : memref<8x8x1xf32, #tpu.memory_space<vmem>>, vector<8x8x1xf32>,
      %cst_172 = arith.constant 0.000000e+00 : f32
      %280 = vector.broadcast %cst_172 : f32 to vector<8x32xf32>
      %c0_173 = arith.constant 0 : index
      %c0_174 = arith.constant 0 : index
      %281 = vector.load %arg12[%c0_173, %c0_174] : memref<8x32xf32, #tpu.memory_space<vmem>>, vector<8x32xf32>
      tpu.vector_store %arg12[%c0_173, %c0_174], %280 {strides = array<i32>} : memref<8x32xf32, #tpu.memory_space<vmem>>, vector<8x32xf32>,
    } else {
    }
    %c0 = arith.constant 0 : index
    %c0_1 = arith.constant 0 : index
    %c0_2 = arith.constant 0 : index
    %3 = vector.load %arg4[%c0, %c0_1, %c0_2] : memref<1x8x32xf32, #tpu.memory_space<vmem>>, vector<1x8x32xf32>
    %4 = vector.shape_cast %3 : vector<1x8x32xf32> to vector<8x32xf32>
    %c32 = arith.constant 32 : index
    %c0_3 = arith.constant 0 : index
    %5 = vector.load %arg5[%c32, %c0_3] : memref<96x32xf32, #tpu.memory_space<vmem>>, vector<64x32xf32>
    %cst = arith.constant dense<0.000000e+00> : vector<8x64xf32>
    %6 = tpu.matmul %4, %5, %cst {dimension_numbers = #tpu.dot_dimension_numbers<[1], [1], [0], [0], [0, 0, 1, 0], [], []>} : vector<8x32xf32>, vector<64x32xf32>, vector<8x64xf32> -> vector<8x64xf32>
    %7 = vector.extract_strided_slice %6 {offsets = [0, 0], sizes = [8, 32], strides = [1, 1]} : vector<8x64xf32> to vector<8x32xf32>
    %8 = vector.extract_strided_slice %6 {offsets = [0, 32], sizes = [8, 32], strides = [1, 1]} : vector<8x64xf32> to vector<8x32xf32>
    %c0_4 = arith.constant 0 : index
    %c0_5 = arith.constant 0 : index
    %9 = vector.load %arg9[%c0_4, %c0_5] : memref<8x32xf32, #tpu.memory_space<vmem>>, vector<8x32xf32>
    %10 = vector.extract_strided_slice %9 {offsets = [0, 0], sizes = [8, 4], strides = [1, 1]} : vector<8x32xf32> to vector<8x4xf32>
    %11 = vector.extract_strided_slice %7 {offsets = [0, 0], sizes = [8, 4], strides = [1, 1]} : vector<8x32xf32> to vector<8x4xf32>
    %12 = vector.extract_strided_slice %8 {offsets = [0, 0], sizes = [8, 4], strides = [1, 1]} : vector<8x32xf32> to vector<8x4xf32>
    %cst_6 = arith.constant dense<0.000000e+00> : vector<8x8xf32>
    %13 = tpu.matmul %10, %11, %cst_6 {dimension_numbers = #tpu.dot_dimension_numbers<[1], [1], [0], [0], [0, 0, 1, 0], [], []>} : vector<8x4xf32>, vector<8x4xf32>, vector<8x8xf32> -> vector<8x8xf32>
    %c0_7 = arith.constant 0 : index
    %c0_8 = arith.constant 0 : index
    %c0_9 = arith.constant 0 : index
    %14 = vector.load %arg10[%c0_7, %c0_8, %c0_9] : memref<8x8x1xf32, #tpu.memory_space<vmem>>, vector<1x8x1xf32>
    %15 = vector.shape_cast %14 : vector<1x8x1xf32> to vector<8x1xf32>
    %c0_10 = arith.constant 0 : index
    %c0_11 = arith.constant 0 : index
    %c0_12 = arith.constant 0 : index
    %16 = vector.load %arg11[%c0_10, %c0_11, %c0_12] : memref<8x8x1xf32, #tpu.memory_space<vmem>>, vector<1x8x1xf32>
    %17 = vector.shape_cast %16 : vector<1x8x1xf32> to vector<8x1xf32>
    %cst_13 = arith.constant dense<0xFF800000> : vector<8xf32>
    %18 = vector.multi_reduction <maximumf>, %13, %cst_13 [1] : vector<8x8xf32> to vector<8xf32>
    %19 = vector.shape_cast %18 : vector<8xf32> to vector<8x1xf32>
    %20 = arith.maximumf %15, %19 : vector<8x1xf32>
    %21 = arith.subf %15, %20 : vector<8x1xf32>
    %22 = math.exp %21 : vector<8x1xf32>
    %23 = vector.broadcast %20 : vector<8x1xf32> to vector<8x8xf32>
    %24 = arith.subf %13, %23 : vector<8x8xf32>
    %25 = math.exp %24 : vector<8x8xf32>
    %26 = arith.mulf %22, %17 : vector<8x1xf32>
    %cst_14 = arith.constant dense<0.000000e+00> : vector<8xf32>
    %27 = vector.multi_reduction <add>, %25, %cst_14 [1] : vector<8x8xf32> to vector<8xf32>
    %28 = vector.shape_cast %27 : vector<8xf32> to vector<8x1xf32>
    %29 = arith.addf %26, %28 : vector<8x1xf32>
    %c0_15 = arith.constant 0 : index
    %c0_16 = arith.constant 0 : index
    %c0_17 = arith.constant 0 : index
    %30 = vector.load %arg11[%c0_15, %c0_16, %c0_17] : memref<8x8x1xf32, #tpu.memory_space<vmem>>, vector<1x8x1xf32>
    %31 = vector.shape_cast %30 : vector<1x8x1xf32> to vector<8x1xf32>
    %32 = vector.shape_cast %29 : vector<8x1xf32> to vector<1x8x1xf32>
    tpu.vector_store %arg11[%c0_15, %c0_16, %c0_17], %32 {strides = array<i32>} : memref<8x8x1xf32, #tpu.memory_space<vmem>>, vector<1x8x1xf32>,
    %c0_18 = arith.constant 0 : index
    %c0_19 = arith.constant 0 : index
    %c0_20 = arith.constant 0 : index
    %33 = vector.load %arg10[%c0_18, %c0_19, %c0_20] : memref<8x8x1xf32, #tpu.memory_space<vmem>>, vector<1x8x1xf32>
    %34 = vector.shape_cast %33 : vector<1x8x1xf32> to vector<8x1xf32>
    %35 = vector.shape_cast %20 : vector<8x1xf32> to vector<1x8x1xf32>
    tpu.vector_store %arg10[%c0_18, %c0_19, %c0_20], %35 {strides = array<i32>} : memref<8x8x1xf32, #tpu.memory_space<vmem>>, vector<1x8x1xf32>,
    %cst_21 = arith.constant dense<0.000000e+00> : vector<8x4xf32>
    %36 = tpu.matmul %25, %12, %cst_21 {dimension_numbers = #tpu.dot_dimension_numbers<[1], [0], [0], [1], [0, 0, 1, 1], [], []>} : vector<8x8xf32>, vector<8x4xf32>, vector<8x4xf32> -> vector<8x4xf32>
    %c0_22 = arith.constant 0 : index
    %c0_23 = arith.constant 0 : index
    %37 = vector.load %arg12[%c0_22, %c0_23] : memref<8x32xf32, #tpu.memory_space<vmem>>, vector<8x4xf32>
    %38 = vector.broadcast %22 : vector<8x1xf32> to vector<8x4xf32>
    %39 = arith.mulf %38, %37 : vector<8x4xf32>
    %40 = arith.addf %39, %36 : vector<8x4xf32>
    %c0_24 = arith.constant 0 : index
    %c0_25 = arith.constant 0 : index
    %41 = vector.load %arg12[%c0_24, %c0_25] : memref<8x32xf32, #tpu.memory_space<vmem>>, vector<8x4xf32>
    tpu.vector_store %arg12[%c0_24, %c0_25], %40 {strides = array<i32>} : memref<8x32xf32, #tpu.memory_space<vmem>>, vector<8x4xf32>,
    %42 = vector.extract_strided_slice %9 {offsets = [0, 4], sizes = [8, 4], strides = [1, 1]} : vector<8x32xf32> to vector<8x4xf32>
    %43 = vector.extract_strided_slice %7 {offsets = [0, 4], sizes = [8, 4], strides = [1, 1]} : vector<8x32xf32> to vector<8x4xf32>
    %44 = vector.extract_strided_slice %8 {offsets = [0, 4], sizes = [8, 4], strides = [1, 1]} : vector<8x32xf32> to vector<8x4xf32>
    %cst_26 = arith.constant dense<0.000000e+00> : vector<8x8xf32>
    %45 = tpu.matmul %42, %43, %cst_26 {dimension_numbers = #tpu.dot_dimension_numbers<[1], [1], [0], [0], [0, 0, 1, 0], [], []>} : vector<8x4xf32>, vector<8x4xf32>, vector<8x8xf32> -> vector<8x8xf32>
    %c1 = arith.constant 1 : index
    %c0_27 = arith.constant 0 : index
    %c0_28 = arith.constant 0 : index
    %46 = vector.load %arg10[%c1, %c0_27, %c0_28] : memref<8x8x1xf32, #tpu.memory_space<vmem>>, vector<1x8x1xf32>
    %47 = vector.shape_cast %46 : vector<1x8x1xf32> to vector<8x1xf32>
    %c1_29 = arith.constant 1 : index
    %c0_30 = arith.constant 0 : index
    %c0_31 = arith.constant 0 : index
    %48 = vector.load %arg11[%c1_29, %c0_30, %c0_31] : memref<8x8x1xf32, #tpu.memory_space<vmem>>, vector<1x8x1xf32>
    %49 = vector.shape_cast %48 : vector<1x8x1xf32> to vector<8x1xf32>
    %cst_32 = arith.constant dense<0xFF800000> : vector<8xf32>
    %50 = vector.multi_reduction <maximumf>, %45, %cst_32 [1] : vector<8x8xf32> to vector<8xf32>
    %51 = vector.shape_cast %50 : vector<8xf32> to vector<8x1xf32>
    %52 = arith.maximumf %47, %51 : vector<8x1xf32>
    %53 = arith.subf %47, %52 : vector<8x1xf32>
    %54 = math.exp %53 : vector<8x1xf32>
    %55 = vector.broadcast %52 : vector<8x1xf32> to vector<8x8xf32>
    %56 = arith.subf %45, %55 : vector<8x8xf32>
    %57 = math.exp %56 : vector<8x8xf32>
    %58 = arith.mulf %54, %49 : vector<8x1xf32>
    %cst_33 = arith.constant dense<0.000000e+00> : vector<8xf32>
    %59 = vector.multi_reduction <add>, %57, %cst_33 [1] : vector<8x8xf32> to vector<8xf32>
    %60 = vector.shape_cast %59 : vector<8xf32> to vector<8x1xf32>
    %61 = arith.addf %58, %60 : vector<8x1xf32>
    %c1_34 = arith.constant 1 : index
    %c0_35 = arith.constant 0 : index
    %c0_36 = arith.constant 0 : index
    %62 = vector.load %arg11[%c1_34, %c0_35, %c0_36] : memref<8x8x1xf32, #tpu.memory_space<vmem>>, vector<1x8x1xf32>
    %63 = vector.shape_cast %62 : vector<1x8x1xf32> to vector<8x1xf32>
    %64 = vector.shape_cast %61 : vector<8x1xf32> to vector<1x8x1xf32>
    tpu.vector_store %arg11[%c1_34, %c0_35, %c0_36], %64 {strides = array<i32>} : memref<8x8x1xf32, #tpu.memory_space<vmem>>, vector<1x8x1xf32>,
    %c1_37 = arith.constant 1 : index
    %c0_38 = arith.constant 0 : index
    %c0_39 = arith.constant 0 : index
    %65 = vector.load %arg10[%c1_37, %c0_38, %c0_39] : memref<8x8x1xf32, #tpu.memory_space<vmem>>, vector<1x8x1xf32>
    %66 = vector.shape_cast %65 : vector<1x8x1xf32> to vector<8x1xf32>
    %67 = vector.shape_cast %52 : vector<8x1xf32> to vector<1x8x1xf32>
    tpu.vector_store %arg10[%c1_37, %c0_38, %c0_39], %67 {strides = array<i32>} : memref<8x8x1xf32, #tpu.memory_space<vmem>>, vector<1x8x1xf32>,
    %cst_40 = arith.constant dense<0.000000e+00> : vector<8x4xf32>
    %68 = tpu.matmul %57, %44, %cst_40 {dimension_numbers = #tpu.dot_dimension_numbers<[1], [0], [0], [1], [0, 0, 1, 1], [], []>} : vector<8x8xf32>, vector<8x4xf32>, vector<8x4xf32> -> vector<8x4xf32>
    %c0_41 = arith.constant 0 : index
    %c4 = arith.constant 4 : index
    %69 = vector.load %arg12[%c0_41, %c4] : memref<8x32xf32, #tpu.memory_space<vmem>>, vector<8x4xf32>
    %70 = vector.broadcast %54 : vector<8x1xf32> to vector<8x4xf32>
    %71 = arith.mulf %70, %69 : vector<8x4xf32>
    %72 = arith.addf %71, %68 : vector<8x4xf32>
    %c0_42 = arith.constant 0 : index
    %c4_43 = arith.constant 4 : index
    %73 = vector.load %arg12[%c0_42, %c4_43] : memref<8x32xf32, #tpu.memory_space<vmem>>, vector<8x4xf32>
    tpu.vector_store %arg12[%c0_42, %c4_43], %72 {strides = array<i32>} : memref<8x32xf32, #tpu.memory_space<vmem>>, vector<8x4xf32>,
    %74 = vector.extract_strided_slice %9 {offsets = [0, 8], sizes = [8, 4], strides = [1, 1]} : vector<8x32xf32> to vector<8x4xf32>
    %75 = vector.extract_strided_slice %7 {offsets = [0, 8], sizes = [8, 4], strides = [1, 1]} : vector<8x32xf32> to vector<8x4xf32>
    %76 = vector.extract_strided_slice %8 {offsets = [0, 8], sizes = [8, 4], strides = [1, 1]} : vector<8x32xf32> to vector<8x4xf32>
    %cst_44 = arith.constant dense<0.000000e+00> : vector<8x8xf32>
    %77 = tpu.matmul %74, %75, %cst_44 {dimension_numbers = #tpu.dot_dimension_numbers<[1], [1], [0], [0], [0, 0, 1, 0], [], []>} : vector<8x4xf32>, vector<8x4xf32>, vector<8x8xf32> -> vector<8x8xf32>
    %c2 = arith.constant 2 : index
    %c0_45 = arith.constant 0 : index
    %c0_46 = arith.constant 0 : index
    %78 = vector.load %arg10[%c2, %c0_45, %c0_46] : memref<8x8x1xf32, #tpu.memory_space<vmem>>, vector<1x8x1xf32>
    %79 = vector.shape_cast %78 : vector<1x8x1xf32> to vector<8x1xf32>
    %c2_47 = arith.constant 2 : index
    %c0_48 = arith.constant 0 : index
    %c0_49 = arith.constant 0 : index
    %80 = vector.load %arg11[%c2_47, %c0_48, %c0_49] : memref<8x8x1xf32, #tpu.memory_space<vmem>>, vector<1x8x1xf32>
    %81 = vector.shape_cast %80 : vector<1x8x1xf32> to vector<8x1xf32>
    %cst_50 = arith.constant dense<0xFF800000> : vector<8xf32>
    %82 = vector.multi_reduction <maximumf>, %77, %cst_50 [1] : vector<8x8xf32> to vector<8xf32>
    %83 = vector.shape_cast %82 : vector<8xf32> to vector<8x1xf32>
    %84 = arith.maximumf %79, %83 : vector<8x1xf32>
    %85 = arith.subf %79, %84 : vector<8x1xf32>
    %86 = math.exp %85 : vector<8x1xf32>
    %87 = vector.broadcast %84 : vector<8x1xf32> to vector<8x8xf32>
    %88 = arith.subf %77, %87 : vector<8x8xf32>
    %89 = math.exp %88 : vector<8x8xf32>
    %90 = arith.mulf %86, %81 : vector<8x1xf32>
    %cst_51 = arith.constant dense<0.000000e+00> : vector<8xf32>
    %91 = vector.multi_reduction <add>, %89, %cst_51 [1] : vector<8x8xf32> to vector<8xf32>
    %92 = vector.shape_cast %91 : vector<8xf32> to vector<8x1xf32>
    %93 = arith.addf %90, %92 : vector<8x1xf32>
    %c2_52 = arith.constant 2 : index
    %c0_53 = arith.constant 0 : index
    %c0_54 = arith.constant 0 : index
    %94 = vector.load %arg11[%c2_52, %c0_53, %c0_54] : memref<8x8x1xf32, #tpu.memory_space<vmem>>, vector<1x8x1xf32>
    %95 = vector.shape_cast %94 : vector<1x8x1xf32> to vector<8x1xf32>
    %96 = vector.shape_cast %93 : vector<8x1xf32> to vector<1x8x1xf32>
    tpu.vector_store %arg11[%c2_52, %c0_53, %c0_54], %96 {strides = array<i32>} : memref<8x8x1xf32, #tpu.memory_space<vmem>>, vector<1x8x1xf32>,
    %c2_55 = arith.constant 2 : index
    %c0_56 = arith.constant 0 : index
    %c0_57 = arith.constant 0 : index
    %97 = vector.load %arg10[%c2_55, %c0_56, %c0_57] : memref<8x8x1xf32, #tpu.memory_space<vmem>>, vector<1x8x1xf32>
    %98 = vector.shape_cast %97 : vector<1x8x1xf32> to vector<8x1xf32>
    %99 = vector.shape_cast %84 : vector<8x1xf32> to vector<1x8x1xf32>
    tpu.vector_store %arg10[%c2_55, %c0_56, %c0_57], %99 {strides = array<i32>} : memref<8x8x1xf32, #tpu.memory_space<vmem>>, vector<1x8x1xf32>,
    %cst_58 = arith.constant dense<0.000000e+00> : vector<8x4xf32>
    %100 = tpu.matmul %89, %76, %cst_58 {dimension_numbers = #tpu.dot_dimension_numbers<[1], [0], [0], [1], [0, 0, 1, 1], [], []>} : vector<8x8xf32>, vector<8x4xf32>, vector<8x4xf32> -> vector<8x4xf32>
    %c0_59 = arith.constant 0 : index
    %c8 = arith.constant 8 : index
    %101 = vector.load %arg12[%c0_59, %c8] : memref<8x32xf32, #tpu.memory_space<vmem>>, vector<8x4xf32>
    %102 = vector.broadcast %86 : vector<8x1xf32> to vector<8x4xf32>
    %103 = arith.mulf %102, %101 : vector<8x4xf32>
    %104 = arith.addf %103, %100 : vector<8x4xf32>
    %c0_60 = arith.constant 0 : index
    %c8_61 = arith.constant 8 : index
    %105 = vector.load %arg12[%c0_60, %c8_61] : memref<8x32xf32, #tpu.memory_space<vmem>>, vector<8x4xf32>
    tpu.vector_store %arg12[%c0_60, %c8_61], %104 {strides = array<i32>} : memref<8x32xf32, #tpu.memory_space<vmem>>, vector<8x4xf32>,
    %106 = vector.extract_strided_slice %9 {offsets = [0, 12], sizes = [8, 4], strides = [1, 1]} : vector<8x32xf32> to vector<8x4xf32>
    %107 = vector.extract_strided_slice %7 {offsets = [0, 12], sizes = [8, 4], strides = [1, 1]} : vector<8x32xf32> to vector<8x4xf32>
    %108 = vector.extract_strided_slice %8 {offsets = [0, 12], sizes = [8, 4], strides = [1, 1]} : vector<8x32xf32> to vector<8x4xf32>
    %cst_62 = arith.constant dense<0.000000e+00> : vector<8x8xf32>
    %109 = tpu.matmul %106, %107, %cst_62 {dimension_numbers = #tpu.dot_dimension_numbers<[1], [1], [0], [0], [0, 0, 1, 0], [], []>} : vector<8x4xf32>, vector<8x4xf32>, vector<8x8xf32> -> vector<8x8xf32>
    %c3 = arith.constant 3 : index
    %c0_63 = arith.constant 0 : index
    %c0_64 = arith.constant 0 : index
    %110 = vector.load %arg10[%c3, %c0_63, %c0_64] : memref<8x8x1xf32, #tpu.memory_space<vmem>>, vector<1x8x1xf32>
    %111 = vector.shape_cast %110 : vector<1x8x1xf32> to vector<8x1xf32>
    %c3_65 = arith.constant 3 : index
    %c0_66 = arith.constant 0 : index
    %c0_67 = arith.constant 0 : index
    %112 = vector.load %arg11[%c3_65, %c0_66, %c0_67] : memref<8x8x1xf32, #tpu.memory_space<vmem>>, vector<1x8x1xf32>
    %113 = vector.shape_cast %112 : vector<1x8x1xf32> to vector<8x1xf32>
    %cst_68 = arith.constant dense<0xFF800000> : vector<8xf32>
    %114 = vector.multi_reduction <maximumf>, %109, %cst_68 [1] : vector<8x8xf32> to vector<8xf32>
    %115 = vector.shape_cast %114 : vector<8xf32> to vector<8x1xf32>
    %116 = arith.maximumf %111, %115 : vector<8x1xf32>
    %117 = arith.subf %111, %116 : vector<8x1xf32>
    %118 = math.exp %117 : vector<8x1xf32>
    %119 = vector.broadcast %116 : vector<8x1xf32> to vector<8x8xf32>
    %120 = arith.subf %109, %119 : vector<8x8xf32>
    %121 = math.exp %120 : vector<8x8xf32>
    %122 = arith.mulf %118, %113 : vector<8x1xf32>
    %cst_69 = arith.constant dense<0.000000e+00> : vector<8xf32>
    %123 = vector.multi_reduction <add>, %121, %cst_69 [1] : vector<8x8xf32> to vector<8xf32>
    %124 = vector.shape_cast %123 : vector<8xf32> to vector<8x1xf32>
    %125 = arith.addf %122, %124 : vector<8x1xf32>
    %c3_70 = arith.constant 3 : index
    %c0_71 = arith.constant 0 : index
    %c0_72 = arith.constant 0 : index
    %126 = vector.load %arg11[%c3_70, %c0_71, %c0_72] : memref<8x8x1xf32, #tpu.memory_space<vmem>>, vector<1x8x1xf32>
    %127 = vector.shape_cast %126 : vector<1x8x1xf32> to vector<8x1xf32>
    %128 = vector.shape_cast %125 : vector<8x1xf32> to vector<1x8x1xf32>
    tpu.vector_store %arg11[%c3_70, %c0_71, %c0_72], %128 {strides = array<i32>} : memref<8x8x1xf32, #tpu.memory_space<vmem>>, vector<1x8x1xf32>,
    %c3_73 = arith.constant 3 : index
    %c0_74 = arith.constant 0 : index
    %c0_75 = arith.constant 0 : index
    %129 = vector.load %arg10[%c3_73, %c0_74, %c0_75] : memref<8x8x1xf32, #tpu.memory_space<vmem>>, vector<1x8x1xf32>
    %130 = vector.shape_cast %129 : vector<1x8x1xf32> to vector<8x1xf32>
    %131 = vector.shape_cast %116 : vector<8x1xf32> to vector<1x8x1xf32>
    tpu.vector_store %arg10[%c3_73, %c0_74, %c0_75], %131 {strides = array<i32>} : memref<8x8x1xf32, #tpu.memory_space<vmem>>, vector<1x8x1xf32>,
    %cst_76 = arith.constant dense<0.000000e+00> : vector<8x4xf32>
    %132 = tpu.matmul %121, %108, %cst_76 {dimension_numbers = #tpu.dot_dimension_numbers<[1], [0], [0], [1], [0, 0, 1, 1], [], []>} : vector<8x8xf32>, vector<8x4xf32>, vector<8x4xf32> -> vector<8x4xf32>
    %c0_77 = arith.constant 0 : index
    %c12 = arith.constant 12 : index
    %133 = vector.load %arg12[%c0_77, %c12] : memref<8x32xf32, #tpu.memory_space<vmem>>, vector<8x4xf32>
    %134 = vector.broadcast %118 : vector<8x1xf32> to vector<8x4xf32>
    %135 = arith.mulf %134, %133 : vector<8x4xf32>
    %136 = arith.addf %135, %132 : vector<8x4xf32>
    %c0_78 = arith.constant 0 : index
    %c12_79 = arith.constant 12 : index
    %137 = vector.load %arg12[%c0_78, %c12_79] : memref<8x32xf32, #tpu.memory_space<vmem>>, vector<8x4xf32>
    tpu.vector_store %arg12[%c0_78, %c12_79], %136 {strides = array<i32>} : memref<8x32xf32, #tpu.memory_space<vmem>>, vector<8x4xf32>,
    %138 = vector.extract_strided_slice %9 {offsets = [0, 16], sizes = [8, 4], strides = [1, 1]} : vector<8x32xf32> to vector<8x4xf32>
    %139 = vector.extract_strided_slice %7 {offsets = [0, 16], sizes = [8, 4], strides = [1, 1]} : vector<8x32xf32> to vector<8x4xf32>
    %140 = vector.extract_strided_slice %8 {offsets = [0, 16], sizes = [8, 4], strides = [1, 1]} : vector<8x32xf32> to vector<8x4xf32>
    %cst_80 = arith.constant dense<0.000000e+00> : vector<8x8xf32>
    %141 = tpu.matmul %138, %139, %cst_80 {dimension_numbers = #tpu.dot_dimension_numbers<[1], [1], [0], [0], [0, 0, 1, 0], [], []>} : vector<8x4xf32>, vector<8x4xf32>, vector<8x8xf32> -> vector<8x8xf32>
    %c4_81 = arith.constant 4 : index
    %c0_82 = arith.constant 0 : index
    %c0_83 = arith.constant 0 : index
    %142 = vector.load %arg10[%c4_81, %c0_82, %c0_83] : memref<8x8x1xf32, #tpu.memory_space<vmem>>, vector<1x8x1xf32>
    %143 = vector.shape_cast %142 : vector<1x8x1xf32> to vector<8x1xf32>
    %c4_84 = arith.constant 4 : index
    %c0_85 = arith.constant 0 : index
    %c0_86 = arith.constant 0 : index
    %144 = vector.load %arg11[%c4_84, %c0_85, %c0_86] : memref<8x8x1xf32, #tpu.memory_space<vmem>>, vector<1x8x1xf32>
    %145 = vector.shape_cast %144 : vector<1x8x1xf32> to vector<8x1xf32>
    %cst_87 = arith.constant dense<0xFF800000> : vector<8xf32>
    %146 = vector.multi_reduction <maximumf>, %141, %cst_87 [1] : vector<8x8xf32> to vector<8xf32>
    %147 = vector.shape_cast %146 : vector<8xf32> to vector<8x1xf32>
    %148 = arith.maximumf %143, %147 : vector<8x1xf32>
    %149 = arith.subf %143, %148 : vector<8x1xf32>
    %150 = math.exp %149 : vector<8x1xf32>
    %151 = vector.broadcast %148 : vector<8x1xf32> to vector<8x8xf32>
    %152 = arith.subf %141, %151 : vector<8x8xf32>
    %153 = math.exp %152 : vector<8x8xf32>
    %154 = arith.mulf %150, %145 : vector<8x1xf32>
    %cst_88 = arith.constant dense<0.000000e+00> : vector<8xf32>
    %155 = vector.multi_reduction <add>, %153, %cst_88 [1] : vector<8x8xf32> to vector<8xf32>
    %156 = vector.shape_cast %155 : vector<8xf32> to vector<8x1xf32>
    %157 = arith.addf %154, %156 : vector<8x1xf32>
    %c4_89 = arith.constant 4 : index
    %c0_90 = arith.constant 0 : index
    %c0_91 = arith.constant 0 : index
    %158 = vector.load %arg11[%c4_89, %c0_90, %c0_91] : memref<8x8x1xf32, #tpu.memory_space<vmem>>, vector<1x8x1xf32>
    %159 = vector.shape_cast %158 : vector<1x8x1xf32> to vector<8x1xf32>
    %160 = vector.shape_cast %157 : vector<8x1xf32> to vector<1x8x1xf32>
    tpu.vector_store %arg11[%c4_89, %c0_90, %c0_91], %160 {strides = array<i32>} : memref<8x8x1xf32, #tpu.memory_space<vmem>>, vector<1x8x1xf32>,
    %c4_92 = arith.constant 4 : index
    %c0_93 = arith.constant 0 : index
    %c0_94 = arith.constant 0 : index
    %161 = vector.load %arg10[%c4_92, %c0_93, %c0_94] : memref<8x8x1xf32, #tpu.memory_space<vmem>>, vector<1x8x1xf32>
    %162 = vector.shape_cast %161 : vector<1x8x1xf32> to vector<8x1xf32>
    %163 = vector.shape_cast %148 : vector<8x1xf32> to vector<1x8x1xf32>
    tpu.vector_store %arg10[%c4_92, %c0_93, %c0_94], %163 {strides = array<i32>} : memref<8x8x1xf32, #tpu.memory_space<vmem>>, vector<1x8x1xf32>,
    %cst_95 = arith.constant dense<0.000000e+00> : vector<8x4xf32>
    %164 = tpu.matmul %153, %140, %cst_95 {dimension_numbers = #tpu.dot_dimension_numbers<[1], [0], [0], [1], [0, 0, 1, 1], [], []>} : vector<8x8xf32>, vector<8x4xf32>, vector<8x4xf32> -> vector<8x4xf32>
    %c0_96 = arith.constant 0 : index
    %c16 = arith.constant 16 : index
    %165 = vector.load %arg12[%c0_96, %c16] : memref<8x32xf32, #tpu.memory_space<vmem>>, vector<8x4xf32>
    %166 = vector.broadcast %150 : vector<8x1xf32> to vector<8x4xf32>
    %167 = arith.mulf %166, %165 : vector<8x4xf32>
    %168 = arith.addf %167, %164 : vector<8x4xf32>
    %c0_97 = arith.constant 0 : index
    %c16_98 = arith.constant 16 : index
    %169 = vector.load %arg12[%c0_97, %c16_98] : memref<8x32xf32, #tpu.memory_space<vmem>>, vector<8x4xf32>
    tpu.vector_store %arg12[%c0_97, %c16_98], %168 {strides = array<i32>} : memref<8x32xf32, #tpu.memory_space<vmem>>, vector<8x4xf32>,
    %170 = vector.extract_strided_slice %9 {offsets = [0, 20], sizes = [8, 4], strides = [1, 1]} : vector<8x32xf32> to vector<8x4xf32>
    %171 = vector.extract_strided_slice %7 {offsets = [0, 20], sizes = [8, 4], strides = [1, 1]} : vector<8x32xf32> to vector<8x4xf32>
    %172 = vector.extract_strided_slice %8 {offsets = [0, 20], sizes = [8, 4], strides = [1, 1]} : vector<8x32xf32> to vector<8x4xf32>
    %cst_99 = arith.constant dense<0.000000e+00> : vector<8x8xf32>
    %173 = tpu.matmul %170, %171, %cst_99 {dimension_numbers = #tpu.dot_dimension_numbers<[1], [1], [0], [0], [0, 0, 1, 0], [], []>} : vector<8x4xf32>, vector<8x4xf32>, vector<8x8xf32> -> vector<8x8xf32>
    %c5 = arith.constant 5 : index
    %c0_100 = arith.constant 0 : index
    %c0_101 = arith.constant 0 : index
    %174 = vector.load %arg10[%c5, %c0_100, %c0_101] : memref<8x8x1xf32, #tpu.memory_space<vmem>>, vector<1x8x1xf32>
    %175 = vector.shape_cast %174 : vector<1x8x1xf32> to vector<8x1xf32>
    %c5_102 = arith.constant 5 : index
    %c0_103 = arith.constant 0 : index
    %c0_104 = arith.constant 0 : index
    %176 = vector.load %arg11[%c5_102, %c0_103, %c0_104] : memref<8x8x1xf32, #tpu.memory_space<vmem>>, vector<1x8x1xf32>
    %177 = vector.shape_cast %176 : vector<1x8x1xf32> to vector<8x1xf32>
    %cst_105 = arith.constant dense<0xFF800000> : vector<8xf32>
    %178 = vector.multi_reduction <maximumf>, %173, %cst_105 [1] : vector<8x8xf32> to vector<8xf32>
    %179 = vector.shape_cast %178 : vector<8xf32> to vector<8x1xf32>
    %180 = arith.maximumf %175, %179 : vector<8x1xf32>
    %181 = arith.subf %175, %180 : vector<8x1xf32>
    %182 = math.exp %181 : vector<8x1xf32>
    %183 = vector.broadcast %180 : vector<8x1xf32> to vector<8x8xf32>
    %184 = arith.subf %173, %183 : vector<8x8xf32>
    %185 = math.exp %184 : vector<8x8xf32>
    %186 = arith.mulf %182, %177 : vector<8x1xf32>
    %cst_106 = arith.constant dense<0.000000e+00> : vector<8xf32>
    %187 = vector.multi_reduction <add>, %185, %cst_106 [1] : vector<8x8xf32> to vector<8xf32>
    %188 = vector.shape_cast %187 : vector<8xf32> to vector<8x1xf32>
    %189 = arith.addf %186, %188 : vector<8x1xf32>
    %c5_107 = arith.constant 5 : index
    %c0_108 = arith.constant 0 : index
    %c0_109 = arith.constant 0 : index
    %190 = vector.load %arg11[%c5_107, %c0_108, %c0_109] : memref<8x8x1xf32, #tpu.memory_space<vmem>>, vector<1x8x1xf32>
    %191 = vector.shape_cast %190 : vector<1x8x1xf32> to vector<8x1xf32>
    %192 = vector.shape_cast %189 : vector<8x1xf32> to vector<1x8x1xf32>
    tpu.vector_store %arg11[%c5_107, %c0_108, %c0_109], %192 {strides = array<i32>} : memref<8x8x1xf32, #tpu.memory_space<vmem>>, vector<1x8x1xf32>,
    %c5_110 = arith.constant 5 : index
    %c0_111 = arith.constant 0 : index
    %c0_112 = arith.constant 0 : index
    %193 = vector.load %arg10[%c5_110, %c0_111, %c0_112] : memref<8x8x1xf32, #tpu.memory_space<vmem>>, vector<1x8x1xf32>
    %194 = vector.shape_cast %193 : vector<1x8x1xf32> to vector<8x1xf32>
    %195 = vector.shape_cast %180 : vector<8x1xf32> to vector<1x8x1xf32>
    tpu.vector_store %arg10[%c5_110, %c0_111, %c0_112], %195 {strides = array<i32>} : memref<8x8x1xf32, #tpu.memory_space<vmem>>, vector<1x8x1xf32>,
    %cst_113 = arith.constant dense<0.000000e+00> : vector<8x4xf32>
    %196 = tpu.matmul %185, %172, %cst_113 {dimension_numbers = #tpu.dot_dimension_numbers<[1], [0], [0], [1], [0, 0, 1, 1], [], []>} : vector<8x8xf32>, vector<8x4xf32>, vector<8x4xf32> -> vector<8x4xf32>
    %c0_114 = arith.constant 0 : index
    %c20 = arith.constant 20 : index
    %197 = vector.load %arg12[%c0_114, %c20] : memref<8x32xf32, #tpu.memory_space<vmem>>, vector<8x4xf32>
    %198 = vector.broadcast %182 : vector<8x1xf32> to vector<8x4xf32>
    %199 = arith.mulf %198, %197 : vector<8x4xf32>
    %200 = arith.addf %199, %196 : vector<8x4xf32>
    %c0_115 = arith.constant 0 : index
    %c20_116 = arith.constant 20 : index
    %201 = vector.load %arg12[%c0_115, %c20_116] : memref<8x32xf32, #tpu.memory_space<vmem>>, vector<8x4xf32>
    tpu.vector_store %arg12[%c0_115, %c20_116], %200 {strides = array<i32>} : memref<8x32xf32, #tpu.memory_space<vmem>>, vector<8x4xf32>,
    %202 = vector.extract_strided_slice %9 {offsets = [0, 24], sizes = [8, 4], strides = [1, 1]} : vector<8x32xf32> to vector<8x4xf32>
    %203 = vector.extract_strided_slice %7 {offsets = [0, 24], sizes = [8, 4], strides = [1, 1]} : vector<8x32xf32> to vector<8x4xf32>
    %204 = vector.extract_strided_slice %8 {offsets = [0, 24], sizes = [8, 4], strides = [1, 1]} : vector<8x32xf32> to vector<8x4xf32>
    %cst_117 = arith.constant dense<0.000000e+00> : vector<8x8xf32>
    %205 = tpu.matmul %202, %203, %cst_117 {dimension_numbers = #tpu.dot_dimension_numbers<[1], [1], [0], [0], [0, 0, 1, 0], [], []>} : vector<8x4xf32>, vector<8x4xf32>, vector<8x8xf32> -> vector<8x8xf32>
    %c6 = arith.constant 6 : index
    %c0_118 = arith.constant 0 : index
    %c0_119 = arith.constant 0 : index
    %206 = vector.load %arg10[%c6, %c0_118, %c0_119] : memref<8x8x1xf32, #tpu.memory_space<vmem>>, vector<1x8x1xf32>
    %207 = vector.shape_cast %206 : vector<1x8x1xf32> to vector<8x1xf32>
    %c6_120 = arith.constant 6 : index
    %c0_121 = arith.constant 0 : index
    %c0_122 = arith.constant 0 : index
    %208 = vector.load %arg11[%c6_120, %c0_121, %c0_122] : memref<8x8x1xf32, #tpu.memory_space<vmem>>, vector<1x8x1xf32>
    %209 = vector.shape_cast %208 : vector<1x8x1xf32> to vector<8x1xf32>
    %cst_123 = arith.constant dense<0xFF800000> : vector<8xf32>
    %210 = vector.multi_reduction <maximumf>, %205, %cst_123 [1] : vector<8x8xf32> to vector<8xf32>
    %211 = vector.shape_cast %210 : vector<8xf32> to vector<8x1xf32>
    %212 = arith.maximumf %207, %211 : vector<8x1xf32>
    %213 = arith.subf %207, %212 : vector<8x1xf32>
    %214 = math.exp %213 : vector<8x1xf32>
    %215 = vector.broadcast %212 : vector<8x1xf32> to vector<8x8xf32>
    %216 = arith.subf %205, %215 : vector<8x8xf32>
    %217 = math.exp %216 : vector<8x8xf32>
    %218 = arith.mulf %214, %209 : vector<8x1xf32>
    %cst_124 = arith.constant dense<0.000000e+00> : vector<8xf32>
    %219 = vector.multi_reduction <add>, %217, %cst_124 [1] : vector<8x8xf32> to vector<8xf32>
    %220 = vector.shape_cast %219 : vector<8xf32> to vector<8x1xf32>
    %221 = arith.addf %218, %220 : vector<8x1xf32>
    %c6_125 = arith.constant 6 : index
    %c0_126 = arith.constant 0 : index
    %c0_127 = arith.constant 0 : index
    %222 = vector.load %arg11[%c6_125, %c0_126, %c0_127] : memref<8x8x1xf32, #tpu.memory_space<vmem>>, vector<1x8x1xf32>
    %223 = vector.shape_cast %222 : vector<1x8x1xf32> to vector<8x1xf32>
    %224 = vector.shape_cast %221 : vector<8x1xf32> to vector<1x8x1xf32>
    tpu.vector_store %arg11[%c6_125, %c0_126, %c0_127], %224 {strides = array<i32>} : memref<8x8x1xf32, #tpu.memory_space<vmem>>, vector<1x8x1xf32>,
    %c6_128 = arith.constant 6 : index
    %c0_129 = arith.constant 0 : index
    %c0_130 = arith.constant 0 : index
    %225 = vector.load %arg10[%c6_128, %c0_129, %c0_130] : memref<8x8x1xf32, #tpu.memory_space<vmem>>, vector<1x8x1xf32>
    %226 = vector.shape_cast %225 : vector<1x8x1xf32> to vector<8x1xf32>
    %227 = vector.shape_cast %212 : vector<8x1xf32> to vector<1x8x1xf32>
    tpu.vector_store %arg10[%c6_128, %c0_129, %c0_130], %227 {strides = array<i32>} : memref<8x8x1xf32, #tpu.memory_space<vmem>>, vector<1x8x1xf32>,
    %cst_131 = arith.constant dense<0.000000e+00> : vector<8x4xf32>
    %228 = tpu.matmul %217, %204, %cst_131 {dimension_numbers = #tpu.dot_dimension_numbers<[1], [0], [0], [1], [0, 0, 1, 1], [], []>} : vector<8x8xf32>, vector<8x4xf32>, vector<8x4xf32> -> vector<8x4xf32>
    %c0_132 = arith.constant 0 : index
    %c24 = arith.constant 24 : index
    %229 = vector.load %arg12[%c0_132, %c24] : memref<8x32xf32, #tpu.memory_space<vmem>>, vector<8x4xf32>
    %230 = vector.broadcast %214 : vector<8x1xf32> to vector<8x4xf32>
    %231 = arith.mulf %230, %229 : vector<8x4xf32>
    %232 = arith.addf %231, %228 : vector<8x4xf32>
    %c0_133 = arith.constant 0 : index
    %c24_134 = arith.constant 24 : index
    %233 = vector.load %arg12[%c0_133, %c24_134] : memref<8x32xf32, #tpu.memory_space<vmem>>, vector<8x4xf32>
    tpu.vector_store %arg12[%c0_133, %c24_134], %232 {strides = array<i32>} : memref<8x32xf32, #tpu.memory_space<vmem>>, vector<8x4xf32>,
    %234 = vector.extract_strided_slice %9 {offsets = [0, 28], sizes = [8, 4], strides = [1, 1]} : vector<8x32xf32> to vector<8x4xf32>
    %235 = vector.extract_strided_slice %7 {offsets = [0, 28], sizes = [8, 4], strides = [1, 1]} : vector<8x32xf32> to vector<8x4xf32>
    %236 = vector.extract_strided_slice %8 {offsets = [0, 28], sizes = [8, 4], strides = [1, 1]} : vector<8x32xf32> to vector<8x4xf32>
    %cst_135 = arith.constant dense<0.000000e+00> : vector<8x8xf32>
    %237 = tpu.matmul %234, %235, %cst_135 {dimension_numbers = #tpu.dot_dimension_numbers<[1], [1], [0], [0], [0, 0, 1, 0], [], []>} : vector<8x4xf32>, vector<8x4xf32>, vector<8x8xf32> -> vector<8x8xf32>
    %c7 = arith.constant 7 : index
    %c0_136 = arith.constant 0 : index
    %c0_137 = arith.constant 0 : index
    %238 = vector.load %arg10[%c7, %c0_136, %c0_137] : memref<8x8x1xf32, #tpu.memory_space<vmem>>, vector<1x8x1xf32>
    %239 = vector.shape_cast %238 : vector<1x8x1xf32> to vector<8x1xf32>
    %c7_138 = arith.constant 7 : index
    %c0_139 = arith.constant 0 : index
    %c0_140 = arith.constant 0 : index
    %240 = vector.load %arg11[%c7_138, %c0_139, %c0_140] : memref<8x8x1xf32, #tpu.memory_space<vmem>>, vector<1x8x1xf32>
    %241 = vector.shape_cast %240 : vector<1x8x1xf32> to vector<8x1xf32>
    %cst_141 = arith.constant dense<0xFF800000> : vector<8xf32>
    %242 = vector.multi_reduction <maximumf>, %237, %cst_141 [1] : vector<8x8xf32> to vector<8xf32>
    %243 = vector.shape_cast %242 : vector<8xf32> to vector<8x1xf32>
    %244 = arith.maximumf %239, %243 : vector<8x1xf32>
    %245 = arith.subf %239, %244 : vector<8x1xf32>
    %246 = math.exp %245 : vector<8x1xf32>
    %247 = vector.broadcast %244 : vector<8x1xf32> to vector<8x8xf32>
    %248 = arith.subf %237, %247 : vector<8x8xf32>
    %249 = math.exp %248 : vector<8x8xf32>
    %250 = arith.mulf %246, %241 : vector<8x1xf32>
    %cst_142 = arith.constant dense<0.000000e+00> : vector<8xf32>
    %251 = vector.multi_reduction <add>, %249, %cst_142 [1] : vector<8x8xf32> to vector<8xf32>
    %252 = vector.shape_cast %251 : vector<8xf32> to vector<8x1xf32>
    %253 = arith.addf %250, %252 : vector<8x1xf32>
    %c7_143 = arith.constant 7 : index
    %c0_144 = arith.constant 0 : index
    %c0_145 = arith.constant 0 : index
    %254 = vector.load %arg11[%c7_143, %c0_144, %c0_145] : memref<8x8x1xf32, #tpu.memory_space<vmem>>, vector<1x8x1xf32>
    %255 = vector.shape_cast %254 : vector<1x8x1xf32> to vector<8x1xf32>
    %256 = vector.shape_cast %253 : vector<8x1xf32> to vector<1x8x1xf32>
    tpu.vector_store %arg11[%c7_143, %c0_144, %c0_145], %256 {strides = array<i32>} : memref<8x8x1xf32, #tpu.memory_space<vmem>>, vector<1x8x1xf32>,
    %c7_146 = arith.constant 7 : index
    %c0_147 = arith.constant 0 : index
    %c0_148 = arith.constant 0 : index
    %257 = vector.load %arg10[%c7_146, %c0_147, %c0_148] : memref<8x8x1xf32, #tpu.memory_space<vmem>>, vector<1x8x1xf32>
    %258 = vector.shape_cast %257 : vector<1x8x1xf32> to vector<8x1xf32>
    %259 = vector.shape_cast %244 : vector<8x1xf32> to vector<1x8x1xf32>
    tpu.vector_store %arg10[%c7_146, %c0_147, %c0_148], %259 {strides = array<i32>} : memref<8x8x1xf32, #tpu.memory_space<vmem>>, vector<1x8x1xf32>,
    %cst_149 = arith.constant dense<0.000000e+00> : vector<8x4xf32>
    %260 = tpu.matmul %249, %236, %cst_149 {dimension_numbers = #tpu.dot_dimension_numbers<[1], [0], [0], [1], [0, 0, 1, 1], [], []>} : vector<8x8xf32>, vector<8x4xf32>, vector<8x4xf32> -> vector<8x4xf32>
    %c0_150 = arith.constant 0 : index
    %c28 = arith.constant 28 : index
    %261 = vector.load %arg12[%c0_150, %c28] : memref<8x32xf32, #tpu.memory_space<vmem>>, vector<8x4xf32>
    %262 = vector.broadcast %246 : vector<8x1xf32> to vector<8x4xf32>
    %263 = arith.mulf %262, %261 : vector<8x4xf32>
    %264 = arith.addf %263, %260 : vector<8x4xf32>
    %c0_151 = arith.constant 0 : index
    %c28_152 = arith.constant 28 : index
    %265 = vector.load %arg12[%c0_151, %c28_152] : memref<8x32xf32, #tpu.memory_space<vmem>>, vector<8x4xf32>
    tpu.vector_store %arg12[%c0_151, %c28_152], %264 {strides = array<i32>} : memref<8x32xf32, #tpu.memory_space<vmem>>, vector<8x4xf32>,
    %c0_i32_153 = arith.constant 0 : i32
    %266 = arith.cmpi eq, %arg2, %c0_i32_153 : i32
    %267 = arith.extui %266 : i1 to i32
    %c0_i32_154 = arith.constant 0 : i32
    %268 = arith.cmpi ne, %267, %c0_i32_154 : i32
    scf.if %268 {
      %c0_155 = arith.constant 0 : index
      %c0_156 = arith.constant 0 : index
      %c0_157 = arith.constant 0 : index
      %269 = vector.load %arg11[%c0_155, %c0_156, %c0_157] : memref<8x8x1xf32, #tpu.memory_space<vmem>>, vector<1x8x1xf32>
      %270 = vector.shape_cast %269 : vector<1x8x1xf32> to vector<8x1xf32>
      %271 = tpu.reciprocal %270 : vector<8x1xf32> -> vector<8x1xf32>
      %c0_158 = arith.constant 0 : index
      %c0_159 = arith.constant 0 : index
      %272 = vector.load %arg12[%c0_158, %c0_159] : memref<8x32xf32, #tpu.memory_space<vmem>>, vector<8x4xf32>
      %273 = vector.broadcast %271 : vector<8x1xf32> to vector<8x4xf32>
      %274 = arith.mulf %272, %273 : vector<8x4xf32>
      %c0_160 = arith.constant 0 : index
      %c0_161 = arith.constant 0 : index
      %275 = vector.load %arg12[%c0_160, %c0_161] : memref<8x32xf32, #tpu.memory_space<vmem>>, vector<8x4xf32>
      tpu.vector_store %arg12[%c0_160, %c0_161], %274 {strides = array<i32>} : memref<8x32xf32, #tpu.memory_space<vmem>>, vector<8x4xf32>,
      %c1_162 = arith.constant 1 : index
      %c0_163 = arith.constant 0 : index
      %c0_164 = arith.constant 0 : index
      %276 = vector.load %arg11[%c1_162, %c0_163, %c0_164] : memref<8x8x1xf32, #tpu.memory_space<vmem>>, vector<1x8x1xf32>
      %277 = vector.shape_cast %276 : vector<1x8x1xf32> to vector<8x1xf32>
      %278 = tpu.reciprocal %277 : vector<8x1xf32> -> vector<8x1xf32>
      %c0_165 = arith.constant 0 : index
      %c4_166 = arith.constant 4 : index
      %279 = vector.load %arg12[%c0_165, %c4_166] : memref<8x32xf32, #tpu.memory_space<vmem>>, vector<8x4xf32>
      %280 = vector.broadcast %278 : vector<8x1xf32> to vector<8x4xf32>
      %281 = arith.mulf %279, %280 : vector<8x4xf32>
      %c0_167 = arith.constant 0 : index
      %c4_168 = arith.constant 4 : index
      %282 = vector.load %arg12[%c0_167, %c4_168] : memref<8x32xf32, #tpu.memory_space<vmem>>, vector<8x4xf32>
      tpu.vector_store %arg12[%c0_167, %c4_168], %281 {strides = array<i32>} : memref<8x32xf32, #tpu.memory_space<vmem>>, vector<8x4xf32>,
      %c2_169 = arith.constant 2 : index
      %c0_170 = arith.constant 0 : index
      %c0_171 = arith.constant 0 : index
      %283 = vector.load %arg11[%c2_169, %c0_170, %c0_171] : memref<8x8x1xf32, #tpu.memory_space<vmem>>, vector<1x8x1xf32>
      %284 = vector.shape_cast %283 : vector<1x8x1xf32> to vector<8x1xf32>
      %285 = tpu.reciprocal %284 : vector<8x1xf32> -> vector<8x1xf32>
      %c0_172 = arith.constant 0 : index
      %c8_173 = arith.constant 8 : index
      %286 = vector.load %arg12[%c0_172, %c8_173] : memref<8x32xf32, #tpu.memory_space<vmem>>, vector<8x4xf32>
      %287 = vector.broadcast %285 : vector<8x1xf32> to vector<8x4xf32>
      %288 = arith.mulf %286, %287 : vector<8x4xf32>
      %c0_174 = arith.constant 0 : index
      %c8_175 = arith.constant 8 : index
      %289 = vector.load %arg12[%c0_174, %c8_175] : memref<8x32xf32, #tpu.memory_space<vmem>>, vector<8x4xf32>
      tpu.vector_store %arg12[%c0_174, %c8_175], %288 {strides = array<i32>} : memref<8x32xf32, #tpu.memory_space<vmem>>, vector<8x4xf32>,
      %c3_176 = arith.constant 3 : index
      %c0_177 = arith.constant 0 : index
      %c0_178 = arith.constant 0 : index
      %290 = vector.load %arg11[%c3_176, %c0_177, %c0_178] : memref<8x8x1xf32, #tpu.memory_space<vmem>>, vector<1x8x1xf32>
      %291 = vector.shape_cast %290 : vector<1x8x1xf32> to vector<8x1xf32>
      %292 = tpu.reciprocal %291 : vector<8x1xf32> -> vector<8x1xf32>
      %c0_179 = arith.constant 0 : index
      %c12_180 = arith.constant 12 : index
      %293 = vector.load %arg12[%c0_179, %c12_180] : memref<8x32xf32, #tpu.memory_space<vmem>>, vector<8x4xf32>
      %294 = vector.broadcast %292 : vector<8x1xf32> to vector<8x4xf32>
      %295 = arith.mulf %293, %294 : vector<8x4xf32>
      %c0_181 = arith.constant 0 : index
      %c12_182 = arith.constant 12 : index
      %296 = vector.load %arg12[%c0_181, %c12_182] : memref<8x32xf32, #tpu.memory_space<vmem>>, vector<8x4xf32>
      tpu.vector_store %arg12[%c0_181, %c12_182], %295 {strides = array<i32>} : memref<8x32xf32, #tpu.memory_space<vmem>>, vector<8x4xf32>,
      %c4_183 = arith.constant 4 : index
      %c0_184 = arith.constant 0 : index
      %c0_185 = arith.constant 0 : index
      %297 = vector.load %arg11[%c4_183, %c0_184, %c0_185] : memref<8x8x1xf32, #tpu.memory_space<vmem>>, vector<1x8x1xf32>
      %298 = vector.shape_cast %297 : vector<1x8x1xf32> to vector<8x1xf32>
      %299 = tpu.reciprocal %298 : vector<8x1xf32> -> vector<8x1xf32>
      %c0_186 = arith.constant 0 : index
      %c16_187 = arith.constant 16 : index
      %300 = vector.load %arg12[%c0_186, %c16_187] : memref<8x32xf32, #tpu.memory_space<vmem>>, vector<8x4xf32>
      %301 = vector.broadcast %299 : vector<8x1xf32> to vector<8x4xf32>
      %302 = arith.mulf %300, %301 : vector<8x4xf32>
      %c0_188 = arith.constant 0 : index
      %c16_189 = arith.constant 16 : index
      %303 = vector.load %arg12[%c0_188, %c16_189] : memref<8x32xf32, #tpu.memory_space<vmem>>, vector<8x4xf32>
      tpu.vector_store %arg12[%c0_188, %c16_189], %302 {strides = array<i32>} : memref<8x32xf32, #tpu.memory_space<vmem>>, vector<8x4xf32>,
      %c5_190 = arith.constant 5 : index
      %c0_191 = arith.constant 0 : index
      %c0_192 = arith.constant 0 : index
      %304 = vector.load %arg11[%c5_190, %c0_191, %c0_192] : memref<8x8x1xf32, #tpu.memory_space<vmem>>, vector<1x8x1xf32>
      %305 = vector.shape_cast %304 : vector<1x8x1xf32> to vector<8x1xf32>
      %306 = tpu.reciprocal %305 : vector<8x1xf32> -> vector<8x1xf32>
      %c0_193 = arith.constant 0 : index
      %c20_194 = arith.constant 20 : index
      %307 = vector.load %arg12[%c0_193, %c20_194] : memref<8x32xf32, #tpu.memory_space<vmem>>, vector<8x4xf32>
      %308 = vector.broadcast %306 : vector<8x1xf32> to vector<8x4xf32>
      %309 = arith.mulf %307, %308 : vector<8x4xf32>
      %c0_195 = arith.constant 0 : index
      %c20_196 = arith.constant 20 : index
      %310 = vector.load %arg12[%c0_195, %c20_196] : memref<8x32xf32, #tpu.memory_space<vmem>>, vector<8x4xf32>
      tpu.vector_store %arg12[%c0_195, %c20_196], %309 {strides = array<i32>} : memref<8x32xf32, #tpu.memory_space<vmem>>, vector<8x4xf32>,
      %c6_197 = arith.constant 6 : index
      %c0_198 = arith.constant 0 : index
      %c0_199 = arith.constant 0 : index
      %311 = vector.load %arg11[%c6_197, %c0_198, %c0_199] : memref<8x8x1xf32, #tpu.memory_space<vmem>>, vector<1x8x1xf32>
      %312 = vector.shape_cast %311 : vector<1x8x1xf32> to vector<8x1xf32>
      %313 = tpu.reciprocal %312 : vector<8x1xf32> -> vector<8x1xf32>
      %c0_200 = arith.constant 0 : index
      %c24_201 = arith.constant 24 : index
      %314 = vector.load %arg12[%c0_200, %c24_201] : memref<8x32xf32, #tpu.memory_space<vmem>>, vector<8x4xf32>
      %315 = vector.broadcast %313 : vector<8x1xf32> to vector<8x4xf32>
      %316 = arith.mulf %314, %315 : vector<8x4xf32>
      %c0_202 = arith.constant 0 : index
      %c24_203 = arith.constant 24 : index
      %317 = vector.load %arg12[%c0_202, %c24_203] : memref<8x32xf32, #tpu.memory_space<vmem>>, vector<8x4xf32>
      tpu.vector_store %arg12[%c0_202, %c24_203], %316 {strides = array<i32>} : memref<8x32xf32, #tpu.memory_space<vmem>>, vector<8x4xf32>,
      %c7_204 = arith.constant 7 : index
      %c0_205 = arith.constant 0 : index
      %c0_206 = arith.constant 0 : index
      %318 = vector.load %arg11[%c7_204, %c0_205, %c0_206] : memref<8x8x1xf32, #tpu.memory_space<vmem>>, vector<1x8x1xf32>
      %319 = vector.shape_cast %318 : vector<1x8x1xf32> to vector<8x1xf32>
      %320 = tpu.reciprocal %319 : vector<8x1xf32> -> vector<8x1xf32>
      %c0_207 = arith.constant 0 : index
      %c28_208 = arith.constant 28 : index
      %321 = vector.load %arg12[%c0_207, %c28_208] : memref<8x32xf32, #tpu.memory_space<vmem>>, vector<8x4xf32>
      %322 = vector.broadcast %320 : vector<8x1xf32> to vector<8x4xf32>
      %323 = arith.mulf %321, %322 : vector<8x4xf32>
      %c0_209 = arith.constant 0 : index
      %c28_210 = arith.constant 28 : index
      %324 = vector.load %arg12[%c0_209, %c28_210] : memref<8x32xf32, #tpu.memory_space<vmem>>, vector<8x4xf32>
      tpu.vector_store %arg12[%c0_209, %c28_210], %323 {strides = array<i32>} : memref<8x32xf32, #tpu.memory_space<vmem>>, vector<8x4xf32>,
      %c0_211 = arith.constant 0 : index
      %c0_212 = arith.constant 0 : index
      %325 = vector.load %arg12[%c0_211, %c0_212] : memref<8x32xf32, #tpu.memory_space<vmem>>, vector<8x32xf32>
      %c0_213 = arith.constant 0 : index
      %c0_214 = arith.constant 0 : index
      %326 = vector.load %arg6[%c0_213, %c0_214] : memref<32x32xf32, #tpu.memory_space<vmem>>, vector<32x32xf32>
      %cst_215 = arith.constant dense<0.000000e+00> : vector<8x32xf32>
      %327 = tpu.matmul %325, %326, %cst_215 {dimension_numbers = #tpu.dot_dimension_numbers<[1], [1], [0], [0], [0, 0, 1, 0], [], []>} : vector<8x32xf32>, vector<32x32xf32>, vector<8x32xf32> -> vector<8x32xf32>
      %c0_216 = arith.constant 0 : index
      %c0_217 = arith.constant 0 : index
      %328 = vector.load %arg7[%c0_216, %c0_217] : memref<1x32xf32, #tpu.memory_space<vmem>>, vector<1x32xf32>
      %329 = vector.broadcast %328 : vector<1x32xf32> to vector<8x32xf32>
      %330 = arith.addf %327, %329 : vector<8x32xf32>
      %c0_218 = arith.constant 0 : index
      %c0_219 = arith.constant 0 : index
      %c0_220 = arith.constant 0 : index
      %331 = vector.load %arg8[%c0_218, %c0_219, %c0_220] : memref<1x8x32xf32, #tpu.memory_space<vmem>>, vector<1x8x32xf32>
      %332 = vector.shape_cast %331 : vector<1x8x32xf32> to vector<8x32xf32>
      %333 = vector.shape_cast %330 : vector<8x32xf32> to vector<1x8x32xf32>
      tpu.vector_store %arg8[%c0_218, %c0_219, %c0_220], %333 {strides = array<i32>} : memref<1x8x32xf32, #tpu.memory_space<vmem>>, vector<1x8x32xf32>,
    } else {
    }
    return
  }
  func.func @transform_0(%arg0: i32, %arg1: i32, %arg2: i32) -> (i32, i32, i32) {
    %c0_i32 = arith.constant 0 : i32
    %c0_i32_0 = arith.constant 0 : i32
    return %arg0, %arg1, %c0_i32 : i32, i32, i32
  }
  func.func @transform_1(%arg0: i32, %arg1: i32, %arg2: i32) -> (i32, i32, i32) {
    %c0_i32 = arith.constant 0 : i32
    %c0_i32_0 = arith.constant 0 : i32
    return %arg0, %arg2, %c0_i32 : i32, i32, i32
  }
  func.func @transform_2(%arg0: i32, %arg1: i32, %arg2: i32) -> (i32, i32) {
    %c0_i32 = arith.constant 0 : i32
    %c0_i32_0 = arith.constant 0 : i32
    %c0_i32_1 = arith.constant 0 : i32
    return %c0_i32, %c0_i32_0 : i32, i32
  }
  func.func @transform_3(%arg0: i32, %arg1: i32, %arg2: i32) -> (i32, i32) {
    %c0_i32 = arith.constant 0 : i32
    %c0_i32_0 = arith.constant 0 : i32
    %c0_i32_1 = arith.constant 0 : i32
    return %c0_i32, %c0_i32_0 : i32, i32
  }
  func.func @transform_4(%arg0: i32, %arg1: i32, %arg2: i32) -> (i32, i32) {
    %c0_i32 = arith.constant 0 : i32
    %c0_i32_0 = arith.constant 0 : i32
    %c0_i32_1 = arith.constant 0 : i32
    return %c0_i32, %c0_i32_0 : i32, i32
  }
  func.func @transform_5(%arg0: i32, %arg1: i32, %arg2: i32) -> (i32, i32, i32) {
    %c0_i32 = arith.constant 0 : i32
    %c0_i32_0 = arith.constant 0 : i32
    return %arg0, %arg1, %c0_i32 : i32, i32, i32
  }
}

</mosaic_0001>

<bundles_post_ra>
// kernel: tpu_custom_call.1
= control target key start
LH: loop header
LB: loop body
LE: loop exit
PB: predicated region body
PF: predicated region fallthrough
CT: control target
= control target key end

     0   :  { %10 = vsyncpa [#allocation7], 0  ;;  %s3399_s0 = inlined_call_operand.vmem [shape: f32[2,8,32], index: 0, kind: input, shape index: {}]   ;;  %s3400_s1 = inlined_call_operand.vmem [shape: f32[2,8,32], index: 1, kind: input, shape index: {}]   ;;  %s3401_s2 = inlined_call_operand.vmem [shape: f32[96,32], index: 2, kind: input, shape index: {}]   ;;  %s3402_s3 = inlined_call_operand.vmem [shape: f32[32,32], index: 3, kind: input, shape index: {}]   ;;  %s3403_s4 = inlined_call_operand.vmem [shape: f32[1,32], index: 4, kind: input, shape index: {}]   ;;  %s3404_s5 = inlined_call_operand.hbm [shape: f32[2,8,32], index: 5, kind: output, shape index: {}]  }
   0x1   :  { %12 = vsyncpa [#allocation7 + $0x1], 0  ;;  %s2864_s18 = smov 0   ;;  %s2866_s19 = smov 0  }
   0x2   :  { %s2868_s20 = smov 0   ;;  %s2870_s21 = smov 0  }
   0x3   :  { %s2872_s22 = smov 0   ;;  %s2874_s23 = smov 0  }
   0x4 LB: > { %s2334_s24 = sadd.s32 4294967295, %s2804_s23   ;;  %s2335_s25 = sadd.s32 4294967294, %s2804_s23   ;;  %s2804_s23 = sphi %s2874_s23, %s18_s23   ;;  %s2800_s22 = sphi %s2872_s22, %s3413_s22   ;;  %s2796_s21 = sphi %s2870_s21, %s3412_s21   ;;  %s2792_s20 = sphi %s2868_s20, %s3411_s20   ;;  %s2788_s19 = sphi %s2866_s19, %s3410_s19   ;;  %s2784_s18 = sphi %s2864_s18, %s3409_s18  }
   0x5   : > { %s37_s26 = sadd.s32 1, %s2800_s22  ;;  %s165_s27 = sadd.s32 1, %s2792_s20 }
   0x6   : > { %p39_p0 = scmp.ge.s32.totalorder %s37_s26, 2  ;;  %p175_p1 = scmp.ne.s32.totalorder %s2792_s20, %s2788_s19 }
   0x7   : > { %p176_p2 = scmp.eq.s32.totalorder %s2334_s24, 1  ;;  %p181_p3 = scmp.ne.s32.totalorder %s2788_s19, %s2784_s18 }
   0x8   : > { %s3415_s26 = smov (%p39_p0, %s37_s26), 0  ;;  %p182_p5 = scmp.eq.s32.totalorder %s2335_s25, 1 }
   0x9   : > { %p2904_p4 = por %p176_p2, %p175_p1  ;;  %s160_s29 = ssub.s32 %s2800_s22, %s3415_s26 }
   0xa   : > { %p2338_p6 = scmp.ge.s32.totalorder %s2804_s23, 1  ;;  %p163_p7 = scmp.eq.s32.totalorder %s160_s29, 0 }
   0xb   : > { %p2911_p8 = por %p182_p5, %p181_p3  ;;  %p229_p9 = scmp.lt.s32.totalorder %s2804_s23, 3 }
   0xc   : > { %s2917_s6 = scalar_select %p163_p7, %s2792_s20, %s165_s27  }
   0xd   : > { %p230_p10 = pnand %p2338_p6, %p229_p9 }
   0xe   : > { %vm289_vm0 = vcmask (!%p230_p10), 261120   ;;  %v396_v0 = vld [vmem:[%s3401_s2 + $0x20] sm:$0xff] (!%p230_p10)  ;;  %v397_v1 = vld [vmem:[%s3401_s2 + $0x28] sm:$0xff] (!%p230_p10)  ;;  %v2806_v2 = vmov (!%p230_p10), 0.0|0.0   ;;  %vm2807_vm2 = vmmov (!%p230_p10), 0   ;;  %v2808_v7 = vmov (!%p230_p10), 0.0  }
   0xf   : > { %233 = sbr.rel (%p230_p10) target bundleno = 2181 (0x885), region = 40  ;;  %2570 = vmatprep.subr.bf16.mxu1 (!%p230_p10), %v2806_v2  ;;  %vm2928_vm1 = vmpackc.low (!%p230_p10), %vm289_vm0, %vm289_vm0  ;;  %v2571_v4 = vpack.c.bf16 (!%p230_p10), %v397_v1, %v396_v0  ;;  %2562 = vmatprep.subr.bf16.mxu0 (!%p230_p10), %v2806_v2  ;;  %v285_v5 = vld [vmem:[%s3401_s2] sm:$0xff] (!%p230_p10)  ;;  %v286_v6 = vld [vmem:[%s3401_s2 + $0x8] sm:$0xff] (!%p230_p10)  ;;  %394 = vst.msk [vmem:[#allocation5] sm:$0xff] (!%p230_p10), %vm289_vm0, %v2808_v7  ;;  %p266_p11 = scmp.lt.s32.totalorder (!%p230_p10), %s2796_s21, 1  ;;  %vm503_vm3 = vcmask (!%p230_p10), 31744  }
  0x10   : > { %2449 = vmatprep.mubr.msk.f32.mxu0 (!%p230_p10), %vm2807_vm2, %v2808_v7  ;;  %2468 = vmatprep.mubr.msk.f32.mxu1 (!%p230_p10), %vm2807_vm2, %v2808_v7  ;;  %v2563_v8 = vpack.c.bf16 (!%p230_p10), %v286_v6, %v285_v5  ;;  %v398_v9 = vld [vmem:[%s3401_s2 + $0x30] sm:$0xff] (!%p230_p10)  ;;  %v399_v10 = vld [vmem:[%s3401_s2 + $0x38] sm:$0xff] (!%p230_p10)  ;;  %v400_v15 = vld [vmem:[%s3401_s2 + $0x40] sm:$0xff] (!%p230_p10)  ;;  %s2809_s10 = smov (!%p230_p10), 124   ;;  %s2811_s11 = smov (!%p230_p10), 120   ;;  %vm377_vm4 = vcmask (!%p230_p10), 7168  }
  0x11   : > { %2573 = vmatpush3.bf16.xpose.msk.msra.mxu1 (!%p230_p10), %vm2928_vm1, %v2571_v4  ;;  %v287_v11 = vld [vmem:[%s3401_s2 + $0x10] sm:$0xff] (!%p230_p10)  ;;  %v288_v12 = vld [vmem:[%s3401_s2 + $0x18] sm:$0xff] (!%p230_p10)  ;;  %v2575_v13 = vpack.c.bf16 (!%p230_p10), %v399_v10, %v398_v9  ;;  %v401_v16 = vld [vmem:[%s3401_s2 + $0x48] sm:$0xff] (!%p230_p10)  ;;  %s2812_s12 = smov (!%p230_p10), 116   ;;  %s2813_s13 = smov (!%p230_p10), 112   ;;  %v2817_v32 = vmov (!%p230_p10), -inf  }
  0x12   : > { %2574 = vmatprep.subr.bf16.mxu1 (!%p230_p10), %v2806_v2  ;;  %2565 = vmatpush3.bf16.xpose.msk.msra.mxu0 (!%p230_p10), %vm2928_vm1, %v2563_v8  ;;  %v2567_v14 = vpack.c.bf16 (!%p230_p10), %v288_v12, %v287_v11  ;;  %v2579_v17 = vpack.c.bf16 (!%p230_p10), %v401_v16, %v400_v15  ;;  %v402_v19 = vld [vmem:[%s3401_s2 + $0x50] sm:$0xff] (!%p230_p10)  ;;  %v403_v20 = vld [vmem:[%s3401_s2 + $0x58] sm:$0xff] (!%p230_p10)  ;;  %s2814_s14 = smov (!%p230_p10), 108   ;;  %s2815_s15 = smov (!%p230_p10), 104   ;;  %378 = vst.msk [vmem:[#allocation3] sm:$0xff] (!%p230_p10), %vm377_vm4, %v2817_v32  ;;  %379 = vst.msk [vmem:[#allocation3 + $0x8] sm:$0xff] (!%p230_p10), %vm377_vm4, %v2817_v32 }
  0x13   : > { %2566 = vmatprep.subr.bf16.mxu0 (!%p230_p10), %v2806_v2  ;;  %v2583_v21 = vpack.c.bf16 (!%p230_p10), %v403_v20, %v402_v19  ;;  %380 = vst.msk [vmem:[#allocation3 + $0x10] sm:$0xff] (!%p230_p10), %vm377_vm4, %v2817_v32  ;;  %381 = vst.msk [vmem:[#allocation3 + $0x18] sm:$0xff] (!%p230_p10), %vm377_vm4, %v2817_v32  ;;  %vm582_vm5 = vcmask (!%p230_p10), 64512   ;;  %v2818_v45 = vmov (!%p230_p10), 0   ;;  %s2819_s17 = smov (!%p230_p10), 96   ;;  %s2820_s24 = smov (!%p230_p10), 88  }
  0x14   : > { %382 = vst.msk [vmem:[#allocation3 + $0x20] sm:$0xff] (!%p230_p10), %vm377_vm4, %v2817_v32  ;;  %383 = vst.msk [vmem:[#allocation3 + $0x28] sm:$0xff] (!%p230_p10), %vm377_vm4, %v2817_v32  ;;  %2676 = vset.pattern.permute.xlu1 (!%p230_p10), %v2818_v45  ;;  %2677 = vset.pattern.permute.xlu0 (!%p230_p10), %v2818_v45  ;;  %s2821_s25 = smov (!%p230_p10), 84   ;;  %s2822_s27 = smov (!%p230_p10), 68   ;;  %vm883_vm6 = vcmask (!%p230_p10), 64544   ;;  %vm1077_vm7 = vcmask (!%p230_p10), 97344  }
  0x15   : > { %384 = vst.msk [vmem:[#allocation3 + $0x30] sm:$0xff] (!%p230_p10), %vm377_vm4, %v2817_v32  ;;  %385 = vst.msk [vmem:[#allocation3 + $0x38] sm:$0xff] (!%p230_p10), %vm377_vm4, %v2817_v32  ;;  %s2823_s29 = smov (!%p230_p10), 80   ;;  %s2824_s7 = smov (!%p230_p10), 76   ;;  %vm1271_vm8 = vcmask (!%p230_p10), 130144   ;;  %vm1465_vm9 = vcmask (!%p230_p10), 162944  }
  0x16   : > { %s267_s8 = scalar_select %p266_p11, %s2796_s21, 1  ;;  %386 = vst.msk [vmem:[#allocation4] sm:$0xff] %vm377_vm4, %v2808_v7  ;;  %387 = vst.msk [vmem:[#allocation4 + $0x8] sm:$0xff] %vm377_vm4, %v2808_v7  ;;  %vm1659_vm10 = vcmask 195744   ;;  %vm1853_vm11 = vcmask 228544   ;;  %vm2047_vm12 = vcmask 261344  }
  0x17   : > { %388 = vst.msk [vmem:[#allocation4 + $0x10] sm:$0xff] %vm377_vm4, %v2808_v7  ;;  %389 = vst.msk [vmem:[#allocation4 + $0x18] sm:$0xff] %vm377_vm4, %v2808_v7 }
  0x18   : > { %s2340_s9 = sshll.u32 %s267_s8, 3  ;;  %390 = vst.msk [vmem:[#allocation4 + $0x20] sm:$0xff] %vm377_vm4, %v2808_v7  ;;  %391 = vst.msk [vmem:[#allocation4 + $0x28] sm:$0xff] %vm377_vm4, %v2808_v7 }
  0x19   : > { %2577 = vmatpush3.bf16.xpose.msk.msra.mxu1 %vm2928_vm1, %v2575_v13  ;;  %s272_s16 = scalar_lea.vmem %s3399_s0, %s2340_s9  ;;  %s279_s8 = scalar_lea.vmem %s3400_s1, %s2340_s9  ;;  %392 = vst.msk [vmem:[#allocation4 + $0x30] sm:$0xff] %vm377_vm4, %v2808_v7  ;;  %393 = vst.msk [vmem:[#allocation4 + $0x38] sm:$0xff] %vm377_vm4, %v2808_v7  ;;  %v3063_v47 = vld [vmem:[#allocation3] sm:$0xff]  ;;  %v3070_v50 = vld [vmem:[#allocation3 + $0x8] sm:$0xff] }
  0x1a   : > { %2578 = vmatprep.subr.bf16.mxu1 %v2806_v2  ;;  %2569 = vmatpush3.bf16.xpose.msk.msra.mxu0 %vm2928_vm1, %v2567_v14  ;;  %v284_v18 = vld [vmem:[%s272_s16] sm:$0xff]  ;;  %s2810_s9 = smov 92   ;;  %s2816_s16 = smov 100  }
  0x1b   : > { %2481 = vmatprep.subr.mxu0 %v2808_v7  ;;  %v395_v22 = vld [vmem:[%s279_s8] sm:$0xff]  ;;  %s2825_s8 = smov 72  }
  0x21   : > { %2581 = vmatpush3.bf16.xpose.msk.msra.mxu1 %vm2928_vm1, %v2579_v17  ;;  %2450 = vmatmul.mubr.msk.f32.vlgmr.msra.gmra.mrb[0].mxu0 %vm289_vm0, %v284_v18 }
  0x22   : > { %2582 = vmatprep.subr.bf16.mxu1 %v2806_v2  ;;  %2483 = vmatprep.mubr.msk.f32.mxu0 %vm2807_vm2, %v2808_v7 }
  0x29   : > { %2585 = vmatpush3.bf16.xpose.msk.msra.mxu1 %vm2928_vm1, %v2583_v21 }
  0x2a   : > { %2471 = vmatprep.subr.mxu1 %v2808_v7 }
  0x30   : > { %2469 = vmatmul.mubr.msk.f32.vlgmr.msra.gmra.mrb[0].mxu1 %vm289_vm0, %v395_v22  ;;  %v3153_v22 = vld [vmem:[#allocation3 + $0x10] sm:$0xff] }
  0x31   : > { %2473 = vmatprep.mubr.msk.f32.mxu1 %vm2807_vm2, %v2808_v7 }
  0xf4   : > { %v371_v23 = vpop.f32.mrb[0].mxu0 }
  0xf5   : > { %v375_v24 = vmul.f32 0.5, %v371_v23  ;;  %v2451_v25 = vpop.f32.mrb[1].mxu0 }
  0xf6   : > { %v3158_v25 = vld [vmem:[#allocation3 + $0x18] sm:$0xff] }
  0xf7   : > { %376 = vst.msk [vmem:[#allocation2] sm:$0xff] %vm289_vm0, %v375_v24 }
  0xfe   : > { %v3007_v28 = vld [vmem:[#allocation2] sm:$0xff] }
 0x103   : > { %v3002_v26 = vpop.f32.mrb[0].mxu1 }
 0x104   : > { %693 = vrot.lane.b32.xlu0 %v3002_v26, %s2809_s10  ;;  %v2470_v27 = vpop.f32.mrb[1].mxu1  ;;  %2472 = vmatpush3.xpose.msk.msra.mxu1 %vm503_vm3, %v3002_v26 }
 0x105   : > { %2476 = vmatprep.subr.mxu1 %v2808_v7 }
 0x107   : > { %2474 = vmatmul.mubr.msk.f32.vlgmr.msra.gmra.mrb[2].mxu1 %vm503_vm3, %v3007_v28 }
 0x108   : > { %691 = vrot.lane.b32.xlu0 %v3007_v28, %s2809_s10  ;;  %2478 = vmatprep.mubr.msk.f32.mxu1 %vm2807_vm2, %v2808_v7  ;;  %s2826_s10 = smov 4  }
 0x10c   : > { %795 = vrot.lane.b32.xlu0 %v3002_v26, %s2810_s9  ;;  %s2827_s9 = smov 8  }
 0x110   : > { %887 = vrot.lane.b32.xlu0 %v3002_v26, %s2811_s11 }
 0x114   : > { %885 = vrot.lane.b32.xlu0 %v3007_v28, %s2811_s11  ;;  %s2828_s11 = smov 12  }
 0x118   : > { %1081 = vrot.lane.b32.xlu0 %v3002_v26, %s2812_s12 }
 0x11c   : > { %1275 = vrot.lane.b32.xlu0 %v3002_v26, %s2813_s13 }
 0x120   : > { %1469 = vrot.lane.b32.xlu0 %v3002_v26, %s2814_s14 }
 0x124   : > { %1663 = vrot.lane.b32.xlu0 %v3002_v26, %s2815_s15 }
 0x128   : > { %1857 = vrot.lane.b32.xlu0 %v3002_v26, %s2816_s16 }
 0x176   : > { %v694_v29 = vpop.permute.xlu0 %693 }
 0x177   : > { %2482 = vmatpush3.xpose.msk.msra.mxu0 %vm503_vm3, %v694_v29 }
 0x178   : > { %2486 = vmatprep.subr.mxu0 %v2808_v7 }
 0x17a   : > { %v692_v30 = vpop.permute.xlu0 %691 }
 0x17b   : > { %2484 = vmatmul.mubr.msk.f32.vlgmr.msra.gmra.mrb[2].mxu0 %vm503_vm3, %v692_v30  ;;  %v3168_v30 = vld [vmem:[#allocation3 + $0x20] sm:$0xff] }
 0x17c   : > { %2488 = vmatprep.mubr.msk.f32.mxu0 %vm2807_vm2, %v2808_v7 }
 0x17e   : > { %v796_v31 = vpop.permute.xlu0 %795 }
 0x17f   : > { %2487 = vmatpush3.msra.mxu0 %v796_v31 }
 0x180   : > { %2491 = vmatprep.subr.mxu0 %v2808_v7 }
 0x182   : > { %v888_v36 = vpop.permute.xlu0 %887 }
 0x186   : > { %v886_v37 = vpop.permute.xlu0 %885 }
 0x18a   : > { %v1082_v38 = vpop.permute.xlu0 %1081 }
 0x18e   : > { %v1276_v42 = vpop.permute.xlu0 %1275 }
 0x192   : > { %v1470_v43 = vpop.permute.xlu0 %1469 }
 0x196   : > { %v1664_v44 = vpop.permute.xlu0 %1663 }
 0x19a   : > { %v1858_v46 = vpop.permute.xlu0 %1857 }
 0x1da   : > { %v3058_v33 = vpop.f32.mrb[2].mxu1 }
 0x1db   : > { %v2475_v34 = vpop.f32.mrb[3].mxu1  ;;  %v583_v35 = vsel %vm582_vm5, %v3058_v33, -inf }
 0x1dc   : > { %584 = vmax.xlane.f32.xlu0 %v583_v35  ;;  %v3178_v35 = vld [vmem:[#allocation3 + $0x28] sm:$0xff] }
 0x24e   : > { %v765_v39 = vpop.f32.mrb[2].mxu0 }
 0x24f   : > { %v2485_v40 = vpop.f32.mrb[3].mxu0  ;;  %v773_v41 = vsel %vm582_vm5, %v765_v39, -inf }
 0x250   : > { %774 = vmax.xlane.f32.xlu1 %v773_v41 }
 0x269   : > { %v585_v48 = vpop.xlane.xlu0 %584 }
 0x26a   : > { %v3066_v49 = vmax.f32 %v3063_v47, %v585_v48 }
 0x26c   : > { %605 = vst.msk [vmem:[#allocation3] sm:$0xff] %vm377_vm4, %v3066_v49 }
 0x2dd   : > { %v775_v51 = vpop.xlane.xlu1 %774 }
 0x2de   : > { %v3073_v52 = vmax.f32 %v3070_v50, %v775_v51  ;;  %v587_v51 = vsub.f32 %v3063_v47, %v3066_v49 }
 0x2e0   : > { %v777_v53 = vsub.f32 %v3070_v50, %v3073_v52  ;;  %794 = vst.msk [vmem:[#allocation3 + $0x8] sm:$0xff] %vm377_vm4, %v3073_v52  ;;  %782 = vperm.xlu1 %2676, %v3073_v52  }
 0x2e4   : > { %1079 = vrot.lane.b32.xlu1 %v3007_v28, %s2812_s12  ;;  %s2829_s12 = smov 16  }
 0x2e8   : > { %1273 = vrot.lane.b32.xlu1 %v3007_v28, %s2813_s13  ;;  %s2830_s13 = smov 20  }
 0x2ec   : > { %1467 = vrot.lane.b32.xlu1 %v3007_v28, %s2814_s14  ;;  %s2831_s14 = smov 24  }
 0x2f0   : > { %1661 = vrot.lane.b32.xlu1 %v3007_v28, %s2815_s15  ;;  %s2832_s15 = smov 28  }
 0x2f4   : > { %1855 = vrot.lane.b32.xlu1 %v3007_v28, %s2816_s16 }
 0x35f   : > { %v783_v54 = vpop.permute.xlu1 %782 }
 0x360   : > { %v785_v55 = vsub.f32 %v765_v39, %v783_v54  ;;  %v3188_v39 = vld [vmem:[#allocation3 + $0x30] sm:$0xff]  ;;  %v588_v54 = vmul.f32 1.442695, %v587_v51 }
 0x362   : > { %v786_v56 = vmul.f32 1.442695, %v785_v55 }
 0x363   : > { %v1080_v58 = vpop.permute.xlu1 %1079 }
 0x364   : > { %2678 = vpow2.f32 %v786_v56 }
 0x365   : > { %2680 = vpow2.f32 %v588_v54  ;;  %v778_v54 = vmul.f32 1.442695, %v777_v53 }
 0x367   : > { %v1274_v59 = vpop.permute.xlu1 %1273 }
 0x36b   : > { %v1468_v60 = vpop.permute.xlu1 %1467 }
 0x36e   : > { %v3090_v57 = vpop.eup %2678 }
 0x36f   : > { %2489 = vmatmul.mubr.msk.f32.vlgmr.msra.gmra.mrb[4].mxu0 %vm582_vm5, %v3090_v57  ;;  %v1662_v61 = vpop.permute.xlu1 %1661 }
 0x370   : > { %2492 = vmatpush3.xpose.msk.msra.mxu0 %vm503_vm3, %v888_v36  ;;  %2493 = vmatprep.mubr.msk.f32.mxu0 %vm2807_vm2, %v2808_v7 }
 0x371   : > { %2501 = vmatprep.subr.mxu0 %v2808_v7 }
 0x373   : > { %2494 = vmatmul.mubr.msk.f32.vlgmr.msra.gmra.mrb[6].mxu0 %vm503_vm3, %v886_v37  ;;  %v1856_v62 = vpop.permute.xlu1 %1855 }
 0x374   : > { %2502 = vmatpush3.xpose.msk.msra.mxu0 %vm503_vm3, %v1082_v38  ;;  %2503 = vmatprep.mubr.msk.f32.mxu0 %vm2807_vm2, %v2808_v7 }
 0x375   : > { %2511 = vmatprep.subr.mxu0 %v2808_v7 }
 0x377   : > { %2504 = vmatmul.mubr.msk.f32.vlgmr.msra.gmra.mrb[8].mxu0 %vm503_vm3, %v1080_v58 }
 0x378   : > { %2512 = vmatpush3.xpose.msk.msra.mxu0 %vm503_vm3, %v1276_v42  ;;  %2513 = vmatprep.mubr.msk.f32.mxu0 %vm2807_vm2, %v2808_v7 }
 0x379   : > { %2521 = vmatprep.subr.mxu0 %v2808_v7 }
 0x37b   : > { %2514 = vmatmul.mubr.msk.f32.vlgmr.msra.gmra.mrb[10].mxu0 %vm503_vm3, %v1274_v59 }
 0x37c   : > { %2522 = vmatpush3.xpose.msk.msra.mxu0 %vm503_vm3, %v1470_v43  ;;  %2523 = vmatprep.mubr.msk.f32.mxu0 %vm2807_vm2, %v2808_v7  ;;  %v3198_v43 = vld [vmem:[#allocation3 + $0x38] sm:$0xff] }
 0x37d   : > { %2531 = vmatprep.subr.mxu0 %v2808_v7 }
 0x37f   : > { %2524 = vmatmul.mubr.msk.f32.vlgmr.msra.gmra.mrb[12].mxu0 %vm503_vm3, %v1468_v60  ;;  %v789_v60 = vsel %vm582_vm5, %v3090_v57, 0.0 }
 0x380   : > { %2532 = vmatpush3.xpose.msk.msra.mxu0 %vm503_vm3, %v1664_v44  ;;  %2533 = vmatprep.mubr.msk.f32.mxu0 %vm2807_vm2, %v2808_v7 }
 0x381   : > { %2541 = vmatprep.subr.mxu0 %v2808_v7 }
 0x383   : > { %2534 = vmatmul.mubr.msk.f32.vlgmr.msra.gmra.mrb[14].mxu0 %vm503_vm3, %v1662_v61 }
 0x384   : > { %2542 = vmatpush3.xpose.msk.msra.mxu0 %vm503_vm3, %v1858_v46  ;;  %2543 = vmatprep.mubr.msk.f32.mxu0 %vm2807_vm2, %v2808_v7 }
 0x385   : > { %2586 = vmatprep.subr.bf16.mxu0 %v2806_v2 }
 0x387   : > { %2544 = vmatmul.mubr.msk.f32.vlgmr.msra.gmra.mrb[16].mxu0 %vm503_vm3, %v1856_v62 }
 0x388   : > { %2559 = vmatprep.mubr.msk.f32.mxu0 %vm2807_vm2, %v2808_v7 }
 0x442   : > { %v3126_v63 = vpop.f32.mrb[4].mxu0 }
 0x443   : > { %v2490_v0 = vpop.f32.mrb[5].mxu0 }
 0x446   : > { %v3128_v1 = vpop.f32.mrb[6].mxu0 }
 0x447   : > { %v2495_v4 = vpop.f32.mrb[7].mxu0  ;;  %v967_v5 = vsel %vm582_vm5, %v3128_v1, -inf }
 0x448   : > { %968 = vmax.xlane.f32.xlu1 %v967_v5 }
 0x44a   : > { %v3132_v6 = vpop.f32.mrb[8].mxu0 }
 0x44b   : > { %v2505_v8 = vpop.f32.mrb[9].mxu0  ;;  %v1161_v9 = vsel %vm582_vm5, %v3132_v6, -inf }
 0x44c   : > { %1162 = vmax.xlane.f32.xlu0 %v1161_v9 }
 0x44e   : > { %v3136_v10 = vpop.f32.mrb[10].mxu0 }
 0x44f   : > { %v2515_v11 = vpop.f32.mrb[11].mxu0  ;;  %v1355_v12 = vsel %vm582_vm5, %v3136_v10, -inf }
 0x450   : > { %1356 = vmax.xlane.f32.xlu0 %v1355_v12 }
 0x452   : > { %v3140_v13 = vpop.f32.mrb[12].mxu0 }
 0x453   : > { %v2525_v14 = vpop.f32.mrb[13].mxu0  ;;  %v1549_v15 = vsel %vm582_vm5, %v3140_v13, -inf }
 0x454   : > { %1550 = vmax.xlane.f32.xlu1 %v1549_v15 }
 0x456   : > { %v3144_v16 = vpop.f32.mrb[14].mxu0 }
 0x457   : > { %v2535_v17 = vpop.f32.mrb[15].mxu0  ;;  %v1743_v18 = vsel %vm582_vm5, %v3144_v16, -inf }
 0x458   : > { %1744 = vmax.xlane.f32.xlu0 %v1743_v18 }
 0x45a   : > { %v3148_v19 = vpop.f32.mrb[16].mxu0 }
 0x45b   : > { %v2545_v20 = vpop.f32.mrb[17].mxu0  ;;  %v1937_v21 = vsel %vm582_vm5, %v3148_v19, -inf }
 0x45c   : > { %1938 = vmax.xlane.f32.xlu1 %v1937_v21 }
 0x46e   : > { %592 = vperm.xlu0 %2677, %v3066_v49   ;;  %v3223_v49 = vpop.eup %2680 }
 0x4d5   : > { %v969_v23 = vpop.xlane.xlu1 %968 }
 0x4d6   : > { %v3156_v24 = vmax.f32 %v3153_v22, %v969_v23 }
 0x4d8   : > { %v971_v27 = vsub.f32 %v3153_v22, %v3156_v24  ;;  %988 = vst.msk [vmem:[#allocation3 + $0x10] sm:$0xff] %vm377_vm4, %v3156_v24  ;;  %976 = vperm.xlu1 %2676, %v3156_v24  }
 0x4d9   : > { %v1163_v28 = vpop.xlane.xlu0 %1162 }
 0x4da   : > { %v3166_v29 = vmax.f32 %v3158_v25, %v1163_v28 }
 0x4dc   : > { %v1165_v31 = vsub.f32 %v3158_v25, %v3166_v29  ;;  %1182 = vst.msk [vmem:[#allocation3 + $0x18] sm:$0xff] %vm377_vm4, %v3166_v29  ;;  %1170 = vperm.xlu1 %2676, %v3166_v29  }
 0x4dd   : > { %v1357_v32 = vpop.xlane.xlu0 %1356 }
 0x4de   : > { %v3176_v34 = vmax.f32 %v3168_v30, %v1357_v32  ;;  %v1166_v52 = vmul.f32 1.442695, %v1165_v31 }
 0x4e0   : > { %v1359_v36 = vsub.f32 %v3168_v30, %v3176_v34  ;;  %1376 = vst.msk [vmem:[#allocation3 + $0x20] sm:$0xff] %vm377_vm4, %v3176_v34  ;;  %606 = vrot.lane.b32.xlu1 %v3002_v26, %s2819_s17 }
 0x4e1   : > { %v1551_v37 = vpop.xlane.xlu1 %1550 }
 0x4e2   : > { %v3186_v38 = vmax.f32 %v3178_v35, %v1551_v37  ;;  %v1360_v53 = vmul.f32 1.442695, %v1359_v36  ;;  %v772_v36 = vld [vmem:[#allocation4 + $0x8] sm:$0xff] }
 0x4e4   : > { %v1553_v40 = vsub.f32 %v3178_v35, %v3186_v38  ;;  %1570 = vst.msk [vmem:[#allocation3 + $0x28] sm:$0xff] %vm377_vm4, %v3186_v38  ;;  %989 = vrot.lane.b32.xlu1 %v3002_v26, %s2820_s24 }
 0x4e5   : > { %v1745_v41 = vpop.xlane.xlu0 %1744 }
 0x4e6   : > { %v3196_v42 = vmax.f32 %v3188_v39, %v1745_v41 }
 0x4e8   : > { %v1747_v44 = vsub.f32 %v3188_v39, %v3196_v42  ;;  %1764 = vst.msk [vmem:[#allocation3 + $0x30] sm:$0xff] %vm377_vm4, %v3196_v42  ;;  %1752 = vperm.xlu0 %2677, %v3196_v42   ;;  %1364 = vperm.xlu1 %2676, %v3176_v34   ;;  %v682_v42 = vld [vmem:[#allocation5] sm:$0xff] }
 0x4e9   : > { %v1939_v45 = vpop.xlane.xlu1 %1938 }
 0x4ea   : > { %v3207_v46 = vmax.f32 %v3198_v43, %v1939_v45 }
 0x4ec   : > { %v1941_v48 = vsub.f32 %v3198_v43, %v3207_v46  ;;  %1958 = vst.msk [vmem:[#allocation3 + $0x38] sm:$0xff] %vm377_vm4, %v3207_v46  ;;  %1183 = vrot.lane.b32.xlu1 %v3002_v26, %s2821_s25  ;;  %1946 = vperm.xlu0 %2677, %v3207_v46  }
 0x4ed   : > { %v593_v55 = vpop.permute.xlu0 %592 }
 0x4ee   : > { %v595_v56 = vsub.f32 %v3058_v33, %v593_v55 }
 0x4f0   : > { %1558 = vperm.xlu1 %2676, %v3186_v38   ;;  %1959 = vrot.lane.b32.xlu0 %v3002_v26, %s2822_s27  ;;  %v596_v47 = vmul.f32 1.442695, %v595_v56  ;;  %v972_v56 = vmul.f32 1.442695, %v971_v27  ;;  %v581_v27 = vld [vmem:[#allocation4] sm:$0xff] }
 0x4f1   : > { %v598_v31 = vmul.f32 %v3223_v49, %v581_v27 }
 0x4f2   : > { %2682 = vpow2.f32 %v596_v47 }
 0x4f4   : > { %1377 = vrot.lane.b32.xlu1 %v3002_v26, %s2823_s29 }
 0x4f8   : > { %1571 = vrot.lane.b32.xlu1 %v3002_v26, %s2824_s7 }
 0x4fc   : > { %1765 = vrot.lane.b32.xlu1 %v3002_v26, %s2825_s8  ;;  %v2683_v58 = vpop.eup %2682 }
 0x4fd   : > { %v599_v59 = vsel %vm582_vm5, %v2683_v58, 0.0 }
 0x500   : > { %685 = vperm.xlu1 %2676, %v3223_v49   ;;  %v1160_v49 = vld [vmem:[#allocation4 + $0x18] sm:$0xff] }
 0x50f   : > { %600 = vadd.xlane.f32.xlu0 %v599_v59 }
 0x524   : > { %790 = vadd.xlane.f32.xlu1 %v789_v60  ;;  %v966_v60 = vld [vmem:[#allocation4 + $0x10] sm:$0xff] }
 0x525   : > { %879 = vrot.lane.b32.xlu0 %v3126_v63, %s2826_s10  ;;  %s263_s10 = sand.u32 1, %s2788_s19  }
 0x526   : > { %s2231_s25 = scalar_lea.sflag [#allocation7], %s263_s10 }
 0x557   : > { %v977_v33 = vpop.permute.xlu1 %976 }
 0x558   : > { %v979_v26 = vsub.f32 %v3128_v1, %v977_v33 }
 0x55a   : > { %v980_v61 = vmul.f32 1.442695, %v979_v26 }
 0x55b   : > { %v1171_v62 = vpop.permute.xlu1 %1170 }
 0x55c   : > { %2684 = vpow2.f32 %v980_v61  ;;  %v1173_v0 = vsub.f32 %v3132_v6, %v1171_v62 }
 0x55e   : > { %v1174_v4 = vmul.f32 1.442695, %v1173_v0  ;;  %v1748_v0 = vmul.f32 1.442695, %v1747_v44 }
 0x55f   : > { %v607_v5 = vpop.permute.xlu1 %606 }
 0x560   : > { %2686 = vpow2.f32 %v1174_v4  ;;  %2477 = vmatpush3.msra.mxu1 %v607_v5 }
 0x561   : > { %2479 = vmatmul.mubr.msk.f32.vlgmr.msra.gmra.mrb[4].mxu1 %vm582_vm5, %v2683_v58  ;;  %2496 = vmatprep.subr.mxu1 %v2808_v7 }
 0x562   : > { %2498 = vmatprep.mubr.msk.f32.mxu1 %vm2807_vm2, %v2808_v7 }
 0x563   : > { %v990_v57 = vpop.permute.xlu1 %989 }
 0x564   : > { %2497 = vmatpush3.msra.mxu1 %v990_v57 }
 0x565   : > { %2506 = vmatprep.subr.mxu1 %v2808_v7 }
 0x566   : > { %v2685_v63 = vpop.eup %2684 }
 0x567   : > { %v1753_v1 = vpop.permute.xlu0 %1752  ;;  %2499 = vmatmul.mubr.msk.f32.vlgmr.msra.gmra.mrb[6].mxu1 %vm582_vm5, %v2685_v63  ;;  %v1365_v6 = vpop.permute.xlu1 %1364  ;;  %v983_v8 = vsel %vm582_vm5, %v2685_v63, 0.0  ;;  %v1354_v63 = vld [vmem:[#allocation4 + $0x20] sm:$0xff] }
 0x568   : > { %v1755_v9 = vsub.f32 %v3144_v16, %v1753_v1  ;;  %v1367_v11 = vsub.f32 %v3136_v10, %v1365_v6  ;;  %984 = vadd.xlane.f32.xlu1 %v983_v8  ;;  %2508 = vmatprep.mubr.msk.f32.mxu1 %vm2807_vm2, %v2808_v7 }
 0x56a   : > { %v2687_v12 = vpop.eup %2686  ;;  %v1368_v14 = vmul.f32 1.442695, %v1367_v11  ;;  %v1756_v15 = vmul.f32 1.442695, %v1755_v9  ;;  %v1742_v9 = vld [vmem:[#allocation4 + $0x30] sm:$0xff] }
 0x56b   : > { %v1184_v17 = vpop.permute.xlu1 %1183  ;;  %v1177_v18 = vsel %vm582_vm5, %v2687_v12, 0.0  ;;  %v1947_v20 = vpop.permute.xlu0 %1946 }
 0x56c   : > { %1178 = vadd.xlane.f32.xlu0 %v1177_v18  ;;  %2507 = vmatpush3.msra.mxu1 %v1184_v17  ;;  %2688 = vpow2.f32 %v1368_v14  ;;  %v1949_v28 = vsub.f32 %v3148_v19, %v1947_v20 }
 0x56d   : > { %2509 = vmatmul.mubr.msk.f32.vlgmr.msra.gmra.mrb[8].mxu1 %vm582_vm5, %v2687_v12  ;;  %2516 = vmatprep.subr.mxu1 %v2808_v7  ;;  %2690 = vpow2.f32 %v1756_v15 }
 0x56e   : > { %2518 = vmatprep.mubr.msk.f32.mxu1 %vm2807_vm2, %v2808_v7  ;;  %v1950_v41 = vmul.f32 1.442695, %v1949_v28 }
 0x56f   : > { %v1559_v10 = vpop.permute.xlu1 %1558  ;;  %v1960_v47 = vpop.permute.xlu0 %1959 }
 0x570   : > { %v1561_v16 = vsub.f32 %v3140_v13, %v1559_v10 }
 0x572   : > { %v1562_v21 = vmul.f32 1.442695, %v1561_v16 }
 0x573   : > { %v1378_v23 = vpop.permute.xlu1 %1377 }
 0x574   : > { %2692 = vpow2.f32 %v1562_v21  ;;  %2517 = vmatpush3.msra.mxu1 %v1378_v23 }
 0x575   : > { %2526 = vmatprep.subr.mxu1 %v2808_v7  ;;  %2694 = vpow2.f32 %v1950_v41 }
 0x576   : > { %v2689_v32 = vpop.eup %2688  ;;  %2696 = vpow2.f32 %v778_v54 }
 0x577   : > { %v1572_v37 = vpop.permute.xlu1 %1571  ;;  %2519 = vmatmul.mubr.msk.f32.vlgmr.msra.gmra.mrb[10].mxu1 %vm582_vm5, %v2689_v32  ;;  %v1371_v45 = vsel %vm582_vm5, %v2689_v32, 0.0  ;;  %v2691_v51 = vpop.eup %2690  ;;  %2698 = vpow2.f32 %v972_v56 }
 0x578   : > { %1372 = vadd.xlane.f32.xlu1 %v1371_v45  ;;  %2527 = vmatpush3.msra.mxu1 %v1572_v37  ;;  %v1759_v13 = vsel %vm582_vm5, %v2691_v51, 0.0  ;;  %2700 = vpow2.f32 %v1166_v52 }
 0x579   : > { %2528 = vmatprep.mubr.msk.f32.mxu1 %vm2807_vm2, %v2808_v7  ;;  %2536 = vmatprep.subr.mxu1 %v2808_v7  ;;  %2702 = vpow2.f32 %v1360_v53 }
 0x57b   : > { %v1766_v55 = vpop.permute.xlu1 %1765 }
 0x57c   : > { %1760 = vadd.xlane.f32.xlu1 %v1759_v13 }
 0x57e   : > { %v3257_v19 = vpop.eup %2692 }
 0x57f   : > { %2529 = vmatmul.mubr.msk.f32.vlgmr.msra.gmra.mrb[12].mxu1 %vm582_vm5, %v3257_v19  ;;  %v3273_v50 = vpop.eup %2694  ;;  %v686_v35 = vpop.permute.xlu1 %685  ;;  %v1565_v52 = vsel %vm582_vm5, %v3257_v19, 0.0 }
 0x580   : > { %2537 = vmatpush3.msra.mxu1 %v1766_v55  ;;  %2538 = vmatprep.mubr.msk.f32.mxu1 %vm2807_vm2, %v2808_v7  ;;  %v2697_v22 = vpop.eup %2696  ;;  %v688_v44 = vmul.f32 %v686_v35, %v682_v42  ;;  %v1953_v53 = vsel %vm582_vm5, %v3273_v50, 0.0 }
 0x581   : > { %2546 = vmatprep.subr.mxu1 %v2808_v7  ;;  %v2699_v24 = vpop.eup %2698  ;;  %v788_v38 = vmul.f32 %v2697_v22, %v772_v36 }
 0x582   : > { %v2701_v25 = vpop.eup %2700  ;;  %v982_v33 = vmul.f32 %v2699_v24, %v966_v60 }
 0x583   : > { %2539 = vmatmul.mubr.msk.f32.vlgmr.msra.gmra.mrb[14].mxu1 %vm582_vm5, %v2691_v51  ;;  %v2703_v29 = vpop.eup %2702  ;;  %v1176_v4 = vmul.f32 %v2701_v25, %v1160_v49 }
 0x584   : > { %2547 = vmatpush3.msra.mxu1 %v1960_v47  ;;  %2548 = vmatprep.mubr.msk.f32.mxu1 %vm2807_vm2, %v2808_v7  ;;  %v1554_v7 = vmul.f32 1.442695, %v1553_v40  ;;  %v1370_v1 = vmul.f32 %v2703_v29, %v1354_v63 }
 0x586   : > { %2704 = vpow2.f32 %v1554_v7 }
 0x587   : > { %2549 = vmatmul.mubr.msk.f32.vlgmr.msra.gmra.mrb[16].mxu1 %vm582_vm5, %v3273_v50  ;;  %2706 = vpow2.f32 %v1748_v0 }
 0x58d   : > { %874 = vperm.xlu1 %2676, %v2697_v22   ;;  %v1942_v22 = vmul.f32 1.442695, %v1941_v48 }
 0x58f   : > { %2708 = vpow2.f32 %v1942_v22  ;;  %v2135_v22 = vld [vmem:[%s3402_s3 + $0x10] sm:$0xff] }
 0x590   : > { %v3287_v30 = vpop.eup %2704 }
 0x591   : > { %1068 = vperm.xlu1 %2676, %v2699_v24   ;;  %v2707_v6 = vpop.eup %2706 }
 0x592   : > { %v1758_v12 = vmul.f32 %v2707_v6, %v1742_v9 }
 0x595   : > { %1262 = vperm.xlu1 %2676, %v2701_v25  }
 0x599   : > { %1456 = vperm.xlu1 %2676, %v2703_v29   ;;  %v2709_v19 = vpop.eup %2708 }
 0x59c   : > { %v601_v58 = vpop.xlane.xlu0 %600 }
 0x59d   : > { %v602_v34 = vadd.f32 %v601_v58, %v598_v31  ;;  %1650 = vperm.xlu1 %2676, %v3287_v30  }
 0x59f   : > { %604 = vst.msk [vmem:[#allocation4] sm:$0xff] %vm377_vm4, %v602_v34 }
 0x5a0   : > { %v880_v26 = vpop.permute.xlu0 %879 }
 0x5a6   : > { %v2052_v24 = vld [vmem:[#allocation4] sm:$0xff] }
 0x5b1   : > { %v791_v40 = vpop.xlane.xlu1 %790 }
 0x5b2   : > { %v792_v59 = vadd.f32 %v791_v40, %v788_v38 }
 0x5b4   : > { %793 = vst.msk [vmem:[#allocation4 + $0x8] sm:$0xff] %vm377_vm4, %v792_v59 }
 0x5bb   : > { %v2062_v25 = vld [vmem:[#allocation4 + $0x8] sm:$0xff] }
 0x5f5   : > { %v985_v61 = vpop.xlane.xlu1 %984 }
 0x5f6   : > { %v986_v62 = vadd.f32 %v985_v61, %v982_v33 }
 0x5f8   : > { %987 = vst.msk [vmem:[#allocation4 + $0x10] sm:$0xff] %vm377_vm4, %v986_v62 }
 0x5f9   : > { %v1179_v5 = vpop.xlane.xlu0 %1178 }
 0x5fa   : > { %v1180_v57 = vadd.f32 %v1179_v5, %v1176_v4 }
 0x5fc   : > { %1181 = vst.msk [vmem:[#allocation4 + $0x18] sm:$0xff] %vm377_vm4, %v1180_v57 }
 0x5ff   : > { %v2072_v27 = vld [vmem:[#allocation4 + $0x10] sm:$0xff] }
 0x603   : > { %v2082_v7 = vld [vmem:[#allocation4 + $0x18] sm:$0xff] }
 0x604   : > { %2710 = vrcp.f32 %v2082_v7  ;;  %v2136_v7 = vld [vmem:[%s3402_s3 + $0x18] sm:$0xff] }
 0x605   : > { %v1373_v8 = vpop.xlane.xlu1 %1372  ;;  %2712 = vrcp.f32 %v2052_v24  ;;  %v2591_v24 = vpack.c.bf16 %v2136_v7, %v2135_v22 }
 0x606   : > { %v1374_v11 = vadd.f32 %v1373_v8, %v1370_v1  ;;  %2714 = vrcp.f32 %v2062_v25  ;;  %v1548_v1 = vld [vmem:[#allocation4 + $0x28] sm:$0xff] }
 0x607   : > { %2716 = vrcp.f32 %v2072_v27 }
 0x608   : > { %1375 = vst.msk [vmem:[#allocation4 + $0x20] sm:$0xff] %vm377_vm4, %v1374_v11 }
 0x609   : > { %v1761_v14 = vpop.xlane.xlu1 %1760 }
 0x60a   : > { %v1762_v39 = vadd.f32 %v1761_v14, %v1758_v12 }
 0x60c   : > { %1763 = vst.msk [vmem:[#allocation4 + $0x30] sm:$0xff] %vm377_vm4, %v1762_v39 }
 0x60d   : > { %v875_v20 = vpop.permute.xlu1 %874 }
 0x60e   : > { %v2711_v43 = vpop.eup %2710 }
 0x60f   : > { %v2092_v46 = vld [vmem:[#allocation4 + $0x20] sm:$0xff]  ;;  %v2713_v48 = vpop.eup %2712 }
 0x610   : > { %2718 = vrcp.f32 %v2092_v46  ;;  %v2715_v29 = vpop.eup %2714 }
 0x611   : > { %v2717_v31 = vpop.eup %2716  ;;  %v1069_v36 = vpop.permute.xlu1 %1068 }
 0x613   : > { %v2112_v50 = vld [vmem:[#allocation4 + $0x30] sm:$0xff] }
 0x614   : > { %2720 = vrcp.f32 %v2112_v50 }
 0x615   : > { %v1263_v60 = vpop.permute.xlu1 %1262 }
 0x619   : > { %v1457_v62 = vpop.permute.xlu1 %1456 }
 0x61a   : > { %v2719_v58 = vpop.eup %2718 }
 0x61d   : > { %v1651_v0 = vpop.permute.xlu1 %1650 }
 0x61e   : > { %v2721_v34 = vpop.eup %2720 }
 0x634   : > { %v678_v15 = vpop.f32.mrb[4].mxu1 }
 0x635   : > { %v689_v17 = vadd.f32 %v688_v44, %v678_v15  ;;  %v2480_v18 = vpop.f32.mrb[5].mxu1  ;;  %v1936_v15 = vld [vmem:[#allocation4 + $0x38] sm:$0xff] }
 0x637   : > { %690 = vst.msk [vmem:[#allocation5] sm:$0xff] %vm503_vm3, %v689_v17 }
 0x63a   : > { %v1061_v10 = vpop.f32.mrb[6].mxu1 }
 0x63b   : > { %1073 = vrot.lane.b32.xlu0 %v1061_v10, %s2827_s9  ;;  %v2500_v16 = vpop.f32.mrb[7].mxu1  ;;  %v1952_v10 = vmul.f32 %v2709_v19, %v1936_v15  ;;  %s2339_s9 = sshll.u32 %s263_s10, 3 }
 0x63e   : > { %v871_v21 = vld [vmem:[#allocation5] sm:$0xff] }
 0x63f   : > { %v877_v23 = vmul.f32 %v875_v20, %v871_v21 }
 0x640   : > { %v1255_v28 = vpop.f32.mrb[8].mxu1 }
 0x641   : > { %v882_v32 = vadd.f32 %v880_v26, %v877_v23  ;;  %1267 = vrot.lane.b32.xlu0 %v1255_v28, %s2828_s11  ;;  %v2510_v37 = vpop.f32.mrb[9].mxu1 }
 0x643   : > { %884 = vst.msk [vmem:[#allocation5] sm:$0xff] %vm883_vm6, %v882_v32 }
 0x64a   : > { %v1449_v41 = vpop.f32.mrb[10].mxu1  ;;  %v1065_v35 = vld [vmem:[#allocation5] sm:$0xff] }
 0x64b   : > { %1461 = vrot.lane.b32.xlu1 %v1449_v41, %s2829_s12  ;;  %v2520_v45 = vpop.f32.mrb[11].mxu1  ;;  %v1071_v38 = vmul.f32 %v1069_v36, %v1065_v35 }
 0x652   : > { %v1643_v51 = vpop.f32.mrb[12].mxu1 }
 0x653   : > { %v2530_v13 = vpop.f32.mrb[13].mxu1 }
 0x654   : > { %v2133_v13 = vld [vmem:[%s3402_s3] sm:$0xff] }
 0x656   : > { %v1837_v54 = vpop.f32.mrb[14].mxu1 }
 0x657   : > { %v2540_v55 = vpop.f32.mrb[15].mxu1 }
 0x65a   : > { %v2031_v56 = vpop.f32.mrb[16].mxu1 }
 0x65b   : > { %v2550_v47 = vpop.f32.mrb[17].mxu1 }
 0x660   : > { %1566 = vadd.xlane.f32.xlu0 %v1565_v52 }
 0x66f   : > { %1954 = vadd.xlane.f32.xlu1 %v1953_v53 }
 0x676   : > { %1655 = vrot.lane.b32.xlu0 %v1643_v51, %s2830_s13  ;;  %s2387_s13 = sshll.u32 %s2796_s21, 7  ;;  %s2833_s21 = smov [#allocation6]  }
 0x677   : > { %s3351_s24 = scalar_lea.hbm %s3404_s5, %s2387_s13  ;;  %s2730_s29 = sshll.u32 %s2833_s21, 4  ;;  %s2731_s29 = int_to_ptr.vmem [resolvable:$false] %s2730_s29 }
 0x678   : > { %s2732_s7 = scalar_lea.vmem %s2731_s29, 256 }
 0x67a   : > { %1844 = vperm.xlu0 %2677, %v2707_v6   ;;  %v1564_v6 = vmul.f32 %v3287_v30, %v1548_v1 }
 0x67e   : > { %1849 = vrot.lane.b32.xlu0 %v1837_v54, %s2831_s14  ;;  %v2134_v54 = vld [vmem:[%s3402_s3 + $0x8] sm:$0xff]  ;;  %s265_s14 = scalar_lea.vmem [#allocation6], %s2339_s9 }
 0x67f   : > { %v2587_v55 = vpack.c.bf16 %v2134_v54, %v2133_v13 }
 0x680   : > { %2038 = vperm.xlu1 %2676, %v2709_v19  }
 0x681   : > { %2589 = vmatpush3.bf16.xpose.msk.msra.mxu0 %vm2928_vm1, %v2587_v55 }
 0x682   : > { %2043 = vrot.lane.b32.xlu0 %v2031_v56, %s2832_s15  ;;  %2590 = vmatprep.subr.bf16.mxu0 %v2806_v2  ;;  %s2245_s15 = sshll.u32 %s265_s14, 4  ;;  %s3353_s15 = int_to_ptr.vmem [resolvable:$true] %s2245_s15 }
 0x683   : > { %s2726_s27 = scalar_lea.vmem %s3353_s15, 128  ;;  %p2733_p1 = scmp.lt.s32.totalorder %s3353_s15, %s2731_s29 }
 0x684   : > { %2087 = vperm.xlu1 %2676, %v2711_v43   ;;  %p2727_p12 = scmp.ne.s32.totalorder %s3353_s15, %s2726_s27  ;;  %p2734_p2 = scmp.lt.s32.totalorder %s2732_s7, %s2726_s27 }
 0x686   : > { %2057 = vperm.xlu0 %2677, %v2713_v48   ;;  %p2728_p13 = pnand %p2727_p12, %p2904_p4  ;;  %p2735_p3 = por %p2734_p2, %p2733_p1 }
 0x688   : > { %p2729_p0 = pneg %p2728_p13 }
 0x689   : > { %2593 = vmatpush3.bf16.xpose.msk.msra.mxu0 %vm2928_vm1, %v2591_v24 }
 0x68a   : > { %2067 = vperm.xlu0 %2677, %v2715_v29   ;;  %p2736_p5 = pnand %p2735_p3, %p2729_p0 }
 0x68e   : > { %2077 = vperm.xlu0 %2677, %v2717_v31  }
 0x692   : > { %2097 = vperm.xlu0 %2677, %v2719_v58  }
 0x696   : > { %2117 = vperm.xlu0 %2677, %v2721_v34  }
 0x6ad   : > { %v1074_v40 = vpop.permute.xlu0 %1073 }
 0x6ae   : > { %v1076_v59 = vadd.f32 %v1074_v40, %v1071_v38 }
 0x6b0   : > { %1078 = vst.msk [vmem:[#allocation5] sm:$0xff] %vm1077_vm7, %v1076_v59 }
 0x6b3   : > { %v1268_v61 = vpop.permute.xlu0 %1267 }
 0x6b7   : > { %v1259_v33 = vld [vmem:[#allocation5] sm:$0xff] }
 0x6b8   : > { %v1265_v26 = vmul.f32 %v1263_v60, %v1259_v33 }
 0x6ba   : > { %v1270_v49 = vadd.f32 %v1268_v61, %v1265_v26 }
 0x6bc   : > { %1272 = vst.msk [vmem:[#allocation5] sm:$0xff] %vm1271_vm8, %v1270_v49  ;;  %v2380_v49 = vld [vmem:[%s3403_s4] ss:$0 sm:$0xff] }
 0x6bd   : > { %v1462_v57 = vpop.permute.xlu1 %1461 }
 0x6c3   : > { %v1453_v4 = vld [vmem:[#allocation5] sm:$0xff] }
 0x6c4   : > { %v1459_v5 = vmul.f32 %v1457_v62, %v1453_v4 }
 0x6c6   : > { %v1464_v63 = vadd.f32 %v1462_v57, %v1459_v5 }
 0x6c8   : > { %1466 = vst.msk [vmem:[#allocation5] sm:$0xff] %vm1465_vm9, %v1464_v63 }
 0x6cf   : > { %v1647_v9 = vld [vmem:[#allocation5] sm:$0xff] }
 0x6d0   : > { %v1653_v12 = vmul.f32 %v1651_v0, %v1647_v9 }
 0x6ed   : > { %v1567_v8 = vpop.xlane.xlu0 %1566 }
 0x6ee   : > { %v1568_v11 = vadd.f32 %v1567_v8, %v1564_v6 }
 0x6f0   : > { %1569 = vst.msk [vmem:[#allocation4 + $0x28] sm:$0xff] %vm377_vm4, %v1568_v11 }
 0x6f1   : > { %v1656_v14 = vpop.permute.xlu0 %1655 }
 0x6f2   : > { %v1658_v39 = vadd.f32 %v1656_v14, %v1653_v12 }
 0x6f4   : > { %1660 = vst.msk [vmem:[#allocation5] sm:$0xff] %vm1659_vm10, %v1658_v39 }
 0x6f7   : > { %v2102_v42 = vld [vmem:[#allocation4 + $0x28] sm:$0xff] }
 0x6f8   : > { %2722 = vrcp.f32 %v2102_v42 }
 0x6f9   : > { %v1845_v44 = vpop.permute.xlu0 %1844 }
 0x6fb   : > { %v1841_v17 = vld [vmem:[#allocation5] sm:$0xff] }
 0x6fc   : > { %v1847_v18 = vmul.f32 %v1845_v44, %v1841_v17  ;;  %v1955_v16 = vpop.xlane.xlu1 %1954 }
 0x6fd   : > { %v1850_v30 = vpop.permute.xlu0 %1849  ;;  %v1956_v20 = vadd.f32 %v1955_v16, %v1952_v10 }
 0x6fe   : > { %v1852_v21 = vadd.f32 %v1850_v30, %v1847_v18 }
 0x6ff   : > { %1957 = vst.msk [vmem:[#allocation4 + $0x38] sm:$0xff] %vm377_vm4, %v1956_v20 }
 0x700   : > { %1854 = vst.msk [vmem:[#allocation5] sm:$0xff] %vm1853_vm11, %v1852_v21  ;;  %v2039_v32 = vpop.permute.xlu1 %2038 }
 0x701   : > { %v2044_v45 = vpop.permute.xlu0 %2043 }
 0x702   : > { %v2723_v23 = vpop.eup %2722 }
 0x703   : > { %2107 = vperm.xlu1 %2676, %v2723_v23  }
 0x704   : > { %v2088_v48 = vpop.permute.xlu1 %2087 }
 0x705   : > { %v2058_v47 = vpop.permute.xlu0 %2057 }
 0x706   : > { %v2122_v37 = vld [vmem:[#allocation4 + $0x38] sm:$0xff] }
 0x707   : > { %v2035_v28 = vld [vmem:[#allocation5] sm:$0xff]  ;;  %2724 = vrcp.f32 %v2122_v37 }
 0x708   : > { %v2041_v41 = vmul.f32 %v2039_v32, %v2035_v28 }
 0x709   : > { %v2068_v25 = vpop.permute.xlu0 %2067 }
 0x70a   : > { %v2046_v51 = vadd.f32 %v2044_v45, %v2041_v41 }
 0x70c   : > { %2048 = vst.msk [vmem:[#allocation5] sm:$0xff] %vm2047_vm12, %v2046_v51 }
 0x70d   : > { %v2078_v2 = vpop.permute.xlu0 %2077 }
 0x711   : > { %v2725_v56 = vpop.eup %2724  ;;  %v2098_v31 = vpop.permute.xlu0 %2097 }
 0x712   : > { %2127 = vperm.xlu1 %2676, %v2725_v56  }
 0x713   : > { %v2054_v52 = vld [vmem:[#allocation5] sm:$0xff] }
 0x714   : > { %v2060_v53 = vmul.f32 %v2058_v47, %v2054_v52 }
 0x715   : > { %v2118_v38 = vpop.permute.xlu0 %2117 }
 0x716   : > { %2061 = vst.msk [vmem:[#allocation5] sm:$0xff] %vm503_vm3, %v2060_v53 }
 0x71d   : > { %v2064_v19 = vld [vmem:[#allocation5] sm:$0xff] }
 0x71e   : > { %v2070_v27 = vmul.f32 %v2068_v25, %v2064_v19 }
 0x720   : > { %2071 = vst.msk [vmem:[#allocation5] sm:$0xff] %vm883_vm6, %v2070_v27 }
 0x727   : > { %v2074_v43 = vld [vmem:[#allocation5] sm:$0xff] }
 0x728   : > { %v2080_v46 = vmul.f32 %v2078_v2, %v2074_v43 }
 0x72a   : > { %2081 = vst.msk [vmem:[#allocation5] sm:$0xff] %vm1077_vm7, %v2080_v46 }
 0x731   : > { %v2084_v50 = vld [vmem:[#allocation5] sm:$0xff] }
 0x732   : > { %v2090_v29 = vmul.f32 %v2088_v48, %v2084_v50 }
 0x734   : > { %2091 = vst.msk [vmem:[#allocation5] sm:$0xff] %vm1271_vm8, %v2090_v29 }
 0x73b   : > { %v2094_v58 = vld [vmem:[#allocation5] sm:$0xff] }
 0x73c   : > { %v2100_v34 = vmul.f32 %v2098_v31, %v2094_v58 }
 0x73e   : > { %2101 = vst.msk [vmem:[#allocation5] sm:$0xff] %vm1465_vm9, %v2100_v34 }
 0x745   : > { %v2104_v3 = vld [vmem:[#allocation5] sm:$0xff] }
 0x782   : > { %v2108_v35 = vpop.permute.xlu1 %2107 }
 0x783   : > { %v2110_v36 = vmul.f32 %v2108_v35, %v2104_v3 }
 0x785   : > { %2111 = vst.msk [vmem:[#allocation5] sm:$0xff] %vm1659_vm10, %v2110_v36 }
 0x78c   : > { %v2114_v40 = vld [vmem:[#allocation5] sm:$0xff] }
 0x78d   : > { %v2120_v59 = vmul.f32 %v2118_v38, %v2114_v40 }
 0x78f   : > { %2121 = vst.msk [vmem:[#allocation5] sm:$0xff] %vm1853_vm11, %v2120_v59 }
 0x791   : > { %v2128_v33 = vpop.permute.xlu1 %2127 }
 0x796   : > { %v2124_v60 = vld [vmem:[#allocation5] sm:$0xff] }
 0x797   : > { %v2130_v26 = vmul.f32 %v2128_v33, %v2124_v60 }
 0x799   : > { %2131 = vst.msk [vmem:[#allocation5] sm:$0xff] %vm2047_vm12, %v2130_v26 }
 0x7a0   : > { %v2132_v61 = vld [vmem:[#allocation5] sm:$0xff] }
 0x7a1   : > { %2560 = vmatmul.mubr.msk.f32.vlgmr.msra.gmra.mrb[18].mxu0 %vm289_vm0, %v2132_v61 }
 0x874   : > { %v2225_v62 = vpop.f32.mrb[18].mxu0 }
 0x875   : > { %v2226_v0 = vadd.f32 %v2380_v49, %v2225_v62  ;;  %v2561_v4 = vpop.f32.mrb[19].mxu0 }
 0x877   : > { %2229 = vst.msk [vmem:[%s265_s14] sm:$0xff] %vm289_vm0, %v2226_v0 }
 0x878   : > { %2739 = shalt.err (!%p2736_p5)
}
 0x879   : > { %s2740_s8 = scalar_lea.hbm %s3351_s24, 128  ;;  %s2744_s11 = scalar_lea.hbm %s3404_s5, 256 }
 0x87a   : > { %p2741_p6 = scmp.ne.s32.totalorder %s3351_s24, %s2740_s8  ;;  %p2745_p10 = scmp.lt.u32.totalorder %s3351_s24, %s3404_s5 }
 0x87b   : > { %p2746_p11 = scmp.lt.u32.totalorder %s2744_s11, %s2740_s8  ;;  %p2748_p13 = scmp.lt.u32.totalorder %s2740_s8, %s3351_s24 }
 0x87c   : > { %p2742_p7 = pnand %p2741_p6, %p2904_p4 }
 0x87d   : > { %p2747_p12 = por %p2746_p11, %p2745_p10 }
 0x87e   : > { %p2743_p9 = pneg %p2742_p7 }
 0x87f   : > { %p2749_p0 = por %p2748_p13, %p2747_p12 }
 0x881   : > { %p2750_p1 = pnand %p2749_p0, %p2743_p9 }
 0x883   : > { %2753 = shalt.err (!%p2750_p1)
}
 0x884   : > { %2594 = dma.vmem_to_hbm [thread:$0]  (%p2904_p4), %s3353_s15, 128, %s3351_s24, %s2231_s25  }
 0x885 PF: > { %p2600_p2 = scmp.ge.s32.totalorder %s2804_s23, 2  ;;  %s2257_s14 = sand.u32 1, %s2784_s18  }
 0x886   : > { %s2258_s16 = scalar_lea.sflag [#allocation7], %s2257_s14 }
 0x887   : > { %p2597_p3 = pnand %p2600_p2, %p2911_p8 }
 0x889   : > { %2779 = dma.done.wait (!%p2597_p3), %s2258_s16, 128  }
 0x88a   : > { %2781 = vsyncadd (!%p2597_p3), %s2258_s16, 4294967168  ;;  %s18_s23 = sadd.s32 1, %s2804_s23   ;;  %s3409_s18 = smov %s2788_s19 }
 0x88b   : > { %p15_p5 = scmp.ge.s32.totalorder %s18_s23, 4   ;;  %s3410_s19 = smov %s2792_s20 }
 0x88c   : > { %s3411_s20 = smov %s2917_s6  ;;  %s3412_s21 = smov %s2800_s22 }
 0x88d   : > { %s3413_s22 = smov %s3415_s26  ;;  %17 = sbr.rel (!%p15_p5) target bundleno = 4 (0x4), region = 100 }
 0x894   :  { %2263 = vsyncpa [#allocation7], 1 }
 0x895   :  { %2265 = vsyncpa [#allocation7 + $0x1], 1 }

</bundles_post_ra>
